<compile_context>
chip_gen: v5e
topology: v5e:2x2
jax: 0.10.0
libtpu: 0.0.40
codegen_flags: <defaults>
</compile_context>

<pallas_src>
import math
from functools import partial

import jax
import jax.numpy as jnp
from jax.experimental import pallas as pl
from jax.experimental.pallas import tpu as pltpu

POINT_FEATURE_DIM = 3
CH_PAD = 8                  # channel-major input padded to a full sublane group
LOCAL_DIMS = [64, 128, 256]
GLOBAL_DIMS = [256]
PC_FEATURE_DIM = 128
NEG_SLOPE = 0.01            # nn.LeakyReLU default
MAX_POINT_TILE = 2048       # multiple of 128; ~8-10 MiB live VMEM per step


def _lrelu(v):
    return jnp.where(v > 0, v, NEG_SLOPE * v)


def pointnet_kernel(x_ref,
                    w0_ref, b0_ref, w1_ref, b1_ref, w2_ref, b2_ref,
                    local_ref, pooled_ref,
                    *, n_inner, tile_n, n_valid, needs_mask):
    """One (point-split c, batch b, point-tile n) grid step.

    x_ref:      (1, 8, TN)        channel-major bf16 input tile (select/*10 folded in w0)
    local_ref:  (1, 256, TN)      bf16 local-feature tile, already NCW — no transpose
    pooled_ref: (1, 1, 256, 1)    running max over points, resident across the n axis
    """
    c = pl.program_id(0)
    n = pl.program_id(2)

    x = x_ref[0]                                                        # (8, TN) bf16

    # local_conv: three 1x1 convs == channel-major matmuls; bf16 MXU, f32 accumulation.
    h = _lrelu(jnp.dot(w0_ref[...], x,
                       preferred_element_type=jnp.float32) + b0_ref[...])   # (64, TN)
    h = _lrelu(jnp.dot(w1_ref[...], h.astype(jnp.bfloat16),
                       preferred_element_type=jnp.float32) + b1_ref[...])   # (128, TN)
    h = _lrelu(jnp.dot(w2_ref[...], h.astype(jnp.bfloat16),
                       preferred_element_type=jnp.float32) + b2_ref[...])   # (256, TN) f32

    # Natively (256, TN): store straight into the NCW-layout output, bf16 (halves HBM).
    local_ref[0] = h.astype(local_ref.dtype)

    # Mask zero-padded points (only traced in when the wrapper actually padded).
    if needs_mask:
        offset = (c * n_inner + n) * tile_n
        lane = jax.lax.broadcasted_iota(jnp.int32, h.shape, 1)
        h = jnp.where(lane < (n_valid - offset), h, -jnp.inf)

    tile_max = jnp.max(h, axis=1, keepdims=True)                        # (256, 1)

    @pl.when(n == 0)
    def _():
        pooled_ref[0, 0] = tile_max

    @pl.when(n > 0)
    def _():
        pooled_ref[0, 0] = jnp.maximum(pooled_ref[0, 0], tile_max)


def _choose_point_tile(n_points: int) -> int:
    """Pick TN: multiple-of-128 divisor if possible, else minimal-padding tile."""
    if n_points <= MAX_POINT_TILE:
        return n_points
    for t in range(MAX_POINT_TILE, 0, -128):
        if n_points % t == 0:
            return t
    # No exact divisor: pick the multiple-of-128 tile minimizing zero-padding waste
    # (ties resolved toward the largest tile); the kernel masks the padded lanes.
    best, best_pad = MAX_POINT_TILE, None
    for t in range(MAX_POINT_TILE, 127, -128):
        pad = (-n_points) % t
        if best_pad is None or pad < best_pad:
            best, best_pad = t, pad
    return best


def _const_spec(shape):
    nd = len(shape)
    return pl.BlockSpec(shape, lambda c, b, n, _nd=nd: (0,) * _nd)


@jax.jit
def pointnet_forward(x, params):
    """x: (B, N, F) with F >= POINT_FEATURE_DIM.
    Returns (global_feature (B, 128) f32, local_feature (B, 256, N) bf16)."""
    B, N, F = x.shape
    (w0, b0), (w1, b1), (w2, b2), (wg0, bg0), (wg1, bg1) = params

    TN = _choose_point_tile(N)
    n_tiles = (N + TN - 1) // TN
    N_pad = n_tiles * TN
    needs_mask = (N_pad != N)
    # Leading "parallel" point-split so both v7x TensorCores are used even for small/odd B.
    NSPLIT = 2 if (n_tiles >= 2 and n_tiles % 2 == 0) else 1
    n_inner = n_tiles // NSPLIT

    # --- wrapper-side repack (all tiny relative to the (B,256,N) output) ---------------
    # Channel-major, lane-dense bf16 input; channel select done here, *10 folded into w0.
    x_cm = jnp.swapaxes(x[..., :POINT_FEATURE_DIM], 1, 2)               # (B, 3, N)
    x_cm = jnp.pad(x_cm, ((0, 0),
                          (0, CH_PAD - POINT_FEATURE_DIM),
                          (0, N_pad - N))).astype(jnp.bfloat16)          # (B, 8, N_pad)

    # Transposed (Cout, Cin) weights for the channel-major matmul chain.
    w0t = jnp.zeros((LOCAL_DIMS[0], CH_PAD), jnp.float32)
    w0t = w0t.at[:, :POINT_FEATURE_DIM].set((w0 * 10.0).T).astype(jnp.bfloat16)  # (64, 8)
    w1t = w1.T.astype(jnp.bfloat16)                                      # (128, 64)
    w2t = w2.T.astype(jnp.bfloat16)                                      # (256, 128)
    b0c = b0.reshape(LOCAL_DIMS[0], 1)
    b1c = b1.reshape(LOCAL_DIMS[1], 1)
    b2c = b2.reshape(LOCAL_DIMS[2], 1)

    in_specs = [
        pl.BlockSpec((1, CH_PAD, TN), lambda c, b, n: (b, 0, c * n_inner + n)),
        _const_spec(w0t.shape), _const_spec(b0c.shape),
        _const_spec(w1t.shape), _const_spec(b1c.shape),
        _const_spec(w2t.shape), _const_spec(b2c.shape),
    ]
    out_specs = [
        # TODO(synk): if a profile shows exposed writeback DMA, add
        # pipeline_mode=pl.Buffered(3) here (write-dominant kernel, cheap in bf16).
        pl.BlockSpec((1, LOCAL_DIMS[-1], TN), lambda c, b, n: (b, 0, c * n_inner + n)),
        pl.BlockSpec((1, 1, LOCAL_DIMS[-1], 1), lambda c, b, n: (c, b, 0, 0)),
    ]
    out_shapes = [
        jax.ShapeDtypeStruct((B, LOCAL_DIMS[-1], N_pad), jnp.bfloat16),
        jax.ShapeDtypeStruct((NSPLIT, B, LOCAL_DIMS[-1], 1), jnp.float32),
    ]

    flops = 2 * B * N_pad * (CH_PAD * LOCAL_DIMS[0]
                             + LOCAL_DIMS[0] * LOCAL_DIMS[1]
                             + LOCAL_DIMS[1] * LOCAL_DIMS[2])
    bytes_accessed = (B * N_pad * CH_PAD * 2                       # packed x read (bf16)
                      + B * N_pad * LOCAL_DIMS[-1] * 2             # local_feature write (bf16)
                      + NSPLIT * B * LOCAL_DIMS[-1] * 4            # pooled partials
                      + 2 * (CH_PAD * 64 + 64 * 128 + 128 * 256)   # bf16 weights
                      + 4 * (64 + 128 + 256))                      # f32 biases

    local_pad, pooled = pl.pallas_call(
        partial(pointnet_kernel, n_inner=n_inner, tile_n=TN,
                n_valid=N, needs_mask=needs_mask),
        out_shape=out_shapes,
        grid=(NSPLIT, B, n_inner),
        in_specs=in_specs,
        out_specs=out_specs,
        compiler_params=pltpu.CompilerParams(
            dimension_semantics=("parallel", "parallel", "arbitrary"),
            vmem_limit_bytes=40 * 1024 * 1024,
        ),
        cost_estimate=pl.CostEstimate(flops=flops, transcendentals=0,
                                      bytes_accessed=bytes_accessed),
    )(x_cm, w0t, b0c, w1t, b1c, w2t, b2c)

    # Combine the per-core partial maxima, then the tiny global MLP in plain XLA.
    g = jnp.max(pooled[..., 0], axis=0)                             # (B, 256) f32
    g = _lrelu(g @ wg0 + bg0)
    g = g @ wg1 + bg1                                               # (B, 128)

    # TODO(synk): when N has no multiple-of-128 divisor, this slice copies the (B,256,N)
    # bf16 output once; acceptable fallback, avoided entirely for aligned N.
    local = local_pad if N_pad == N else local_pad[:, :, :N]
    return g, local


def init_params(key):
    """Deterministic parameter init. Conv1d weights: xavier normal (as in __init__);
    Linear layers: small normal (deterministic synthetic init)."""
    ks = jax.random.split(key, 10)
    params = []
    # local_conv weights stored as (Cin, Cout)
    dims = [POINT_FEATURE_DIM] + LOCAL_DIMS
    for i in range(len(LOCAL_DIMS)):
        fan_in, fan_out = dims[i], dims[i + 1]
        std = math.sqrt(2.0 / (fan_in + fan_out))                   # xavier normal
        w = std * jax.random.normal(ks[2 * i], (fan_in, fan_out), jnp.float32)
        b = 0.01 * jax.random.normal(ks[2 * i + 1], (1, fan_out), jnp.float32)
        params.append((w, b))
    # global_mlp: Linear 256 -> 256, Linear 256 -> 128
    gdims = [LOCAL_DIMS[-1]] + GLOBAL_DIMS + [PC_FEATURE_DIM]
    for i in range(len(gdims) - 1):
        fan_in, fan_out = gdims[i], gdims[i + 1]
        std = 1.0 / math.sqrt(fan_in)
        w = std * jax.random.normal(ks[6 + 2 * i], (fan_in, fan_out), jnp.float32)
        b = 0.01 * jax.random.normal(ks[7 + 2 * i], (1, fan_out), jnp.float32)
        params.append((w, b))
    return tuple(params)


def pointnet_reference(x, params):
    """Pure-JAX f32 reference mirroring the PyTorch forward."""
    (w0, b0), (w1, b1), (w2, b2), (wg0, bg0), (wg1, bg1) = params
    x = x[..., :POINT_FEATURE_DIM] * 10.0                           # (B, N, 3)
    h = _lrelu(jnp.einsum('bnc,cd->bnd', x, w0) + b0)
    h = _lrelu(jnp.einsum('bnc,cd->bnd', h, w1) + b1)
    h = _lrelu(jnp.einsum('bnc,cd->bnd', h, w2) + b2)
    local = jnp.transpose(h, (0, 2, 1))                             # (B, 256, N)
    g = jnp.max(h, axis=1)                                          # (B, 256)
    g = _lrelu(g @ wg0 + bg0)
    g = g @ wg1 + bg1
    return g, local


if __name__ == "__main__":
    key = jax.random.PRNGKey(0)
    k_x, k_p = jax.random.split(key)

    B, N, F = 2, 16, 6                                              # F > 3: exercises the [..., :3] fold
    x = jax.random.normal(k_x, (B, N, F), jnp.float32)
    params = init_params(k_p)

    global_feat, local_feat = pointnet_forward(x, params)
    jax.block_until_ready((global_feat, local_feat))

    g_ref, l_ref = pointnet_reference(x, params)
    assert global_feat.shape == (B, PC_FEATURE_DIM)
    assert local_feat.shape == (B, LOCAL_DIMS[-1], N)
    # bf16 MXU inputs + bf16 local-feature storage vs. pure-f32 reference -> loose tol.
    assert jnp.allclose(global_feat, g_ref, atol=2e-1, rtol=5e-2)
    assert jnp.allclose(local_feat.astype(jnp.float32), l_ref, atol=2e-1, rtol=5e-2)

    print("KERNEL_OK")
</pallas_src>

<mosaic_0001>
module attributes {stable_mosaic.version = 11 : i64} {
  func.func @pointnet_kernel(%arg0: i32, %arg1: i32, %arg2: i32, %arg3: memref<1x8x16xbf16, #tpu.memory_space<vmem>>, %arg4: memref<64x8xbf16, #tpu.memory_space<vmem>>, %arg5: memref<64x1xf32, #tpu.memory_space<vmem>>, %arg6: memref<128x64xbf16, #tpu.memory_space<vmem>>, %arg7: memref<128x1xf32, #tpu.memory_space<vmem>>, %arg8: memref<256x128xbf16, #tpu.memory_space<vmem>>, %arg9: memref<256x1xf32, #tpu.memory_space<vmem>>, %arg10: memref<1x256x16xbf16, #tpu.memory_space<vmem>>, %arg11: memref<1x1x256x1xf32, #tpu.memory_space<vmem>>) attributes {dimension_semantics = [#tpu.dimension_semantics<parallel>, #tpu.dimension_semantics<parallel>, #tpu.dimension_semantics<arbitrary>], iteration_bounds = array<i64: 1, 2, 1>, scalar_prefetch = 0 : i64, scratch_operands = 0 : i64, tpu.core_type = #tpu.core_type<tc>, window_params = [{transform_indices = @transform_0, window_bounds = array<i64: 1, 8, 16>}, {pipeline_mode = #tpu.pipeline_mode<synchronous>, transform_indices = @transform_1, window_bounds = array<i64: 64, 8>}, {pipeline_mode = #tpu.pipeline_mode<synchronous>, transform_indices = @transform_2, window_bounds = array<i64: 64, 1>}, {pipeline_mode = #tpu.pipeline_mode<synchronous>, transform_indices = @transform_3, window_bounds = array<i64: 128, 64>}, {pipeline_mode = #tpu.pipeline_mode<synchronous>, transform_indices = @transform_4, window_bounds = array<i64: 128, 1>}, {pipeline_mode = #tpu.pipeline_mode<synchronous>, transform_indices = @transform_5, window_bounds = array<i64: 256, 128>}, {pipeline_mode = #tpu.pipeline_mode<synchronous>, transform_indices = @transform_6, window_bounds = array<i64: 256, 1>}, {transform_indices = @transform_7, window_bounds = array<i64: 1, 256, 16>}, {transform_indices = @transform_8, window_bounds = array<i64: 1, 1, 256, 1>}]} {
    %c0 = arith.constant 0 : index
    %c0_0 = arith.constant 0 : index
    %c0_1 = arith.constant 0 : index
    %0 = vector.load %arg3[%c0, %c0_0, %c0_1] : memref<1x8x16xbf16, #tpu.memory_space<vmem>>, vector<1x8x16xbf16>
    %1 = vector.shape_cast %0 : vector<1x8x16xbf16> to vector<8x16xbf16>
    %c0_2 = arith.constant 0 : index
    %c0_3 = arith.constant 0 : index
    %2 = vector.load %arg4[%c0_2, %c0_3] : memref<64x8xbf16, #tpu.memory_space<vmem>>, vector<64x8xbf16>
    %cst = arith.constant dense<0.000000e+00> : vector<64x16xf32>
    %3 = tpu.matmul %2, %1, %cst {dimension_numbers = #tpu.dot_dimension_numbers<[1], [0], [0], [1], [0, 0, 1, 1], [], []>} : vector<64x8xbf16>, vector<8x16xbf16>, vector<64x16xf32> -> vector<64x16xf32>
    %c0_4 = arith.constant 0 : index
    %c0_5 = arith.constant 0 : index
    %4 = vector.load %arg5[%c0_4, %c0_5] : memref<64x1xf32, #tpu.memory_space<vmem>>, vector<64x1xf32>
    %5 = vector.broadcast %4 : vector<64x1xf32> to vector<64x16xf32>
    %6 = arith.addf %3, %5 : vector<64x16xf32>
    %cst_6 = arith.constant 0.000000e+00 : f32
    %7 = vector.broadcast %cst_6 : f32 to vector<64x16xf32>
    %8 = arith.cmpf ogt, %6, %7 : vector<64x16xf32>
    %cst_7 = arith.constant 0.00999999977 : f32
    %9 = vector.broadcast %cst_7 : f32 to vector<64x16xf32>
    %10 = arith.mulf %9, %6 : vector<64x16xf32>
    %11 = arith.select %8, %6, %10 : vector<64x16xi1>, vector<64x16xf32>
    %c0_8 = arith.constant 0 : index
    %c0_9 = arith.constant 0 : index
    %12 = vector.load %arg6[%c0_8, %c0_9] : memref<128x64xbf16, #tpu.memory_space<vmem>>, vector<128x64xbf16>
    %13 = arith.truncf %11 : vector<64x16xf32> to vector<64x16xbf16>
    %cst_10 = arith.constant dense<0.000000e+00> : vector<128x16xf32>
    %14 = tpu.matmul %12, %13, %cst_10 {dimension_numbers = #tpu.dot_dimension_numbers<[1], [0], [0], [1], [0, 0, 1, 1], [], []>} : vector<128x64xbf16>, vector<64x16xbf16>, vector<128x16xf32> -> vector<128x16xf32>
    %c0_11 = arith.constant 0 : index
    %c0_12 = arith.constant 0 : index
    %15 = vector.load %arg7[%c0_11, %c0_12] : memref<128x1xf32, #tpu.memory_space<vmem>>, vector<128x1xf32>
    %16 = vector.broadcast %15 : vector<128x1xf32> to vector<128x16xf32>
    %17 = arith.addf %14, %16 : vector<128x16xf32>
    %cst_13 = arith.constant 0.000000e+00 : f32
    %18 = vector.broadcast %cst_13 : f32 to vector<128x16xf32>
    %19 = arith.cmpf ogt, %17, %18 : vector<128x16xf32>
    %cst_14 = arith.constant 0.00999999977 : f32
    %20 = vector.broadcast %cst_14 : f32 to vector<128x16xf32>
    %21 = arith.mulf %20, %17 : vector<128x16xf32>
    %22 = arith.select %19, %17, %21 : vector<128x16xi1>, vector<128x16xf32>
    %c0_15 = arith.constant 0 : index
    %c0_16 = arith.constant 0 : index
    %23 = vector.load %arg8[%c0_15, %c0_16] : memref<256x128xbf16, #tpu.memory_space<vmem>>, vector<256x128xbf16>
    %24 = arith.truncf %22 : vector<128x16xf32> to vector<128x16xbf16>
    %cst_17 = arith.constant dense<0.000000e+00> : vector<256x16xf32>
    %25 = tpu.matmul %23, %24, %cst_17 {dimension_numbers = #tpu.dot_dimension_numbers<[1], [0], [0], [1], [0, 0, 1, 1], [], []>} : vector<256x128xbf16>, vector<128x16xbf16>, vector<256x16xf32> -> vector<256x16xf32>
    %c0_18 = arith.constant 0 : index
    %c0_19 = arith.constant 0 : index
    %26 = vector.load %arg9[%c0_18, %c0_19] : memref<256x1xf32, #tpu.memory_space<vmem>>, vector<256x1xf32>
    %27 = vector.broadcast %26 : vector<256x1xf32> to vector<256x16xf32>
    %28 = arith.addf %25, %27 : vector<256x16xf32>
    %cst_20 = arith.constant 0.000000e+00 : f32
    %29 = vector.broadcast %cst_20 : f32 to vector<256x16xf32>
    %30 = arith.cmpf ogt, %28, %29 : vector<256x16xf32>
    %cst_21 = arith.constant 0.00999999977 : f32
    %31 = vector.broadcast %cst_21 : f32 to vector<256x16xf32>
    %32 = arith.mulf %31, %28 : vector<256x16xf32>
    %33 = arith.select %30, %28, %32 : vector<256x16xi1>, vector<256x16xf32>
    %34 = arith.truncf %33 : vector<256x16xf32> to vector<256x16xbf16>
    %c0_22 = arith.constant 0 : index
    %c0_23 = arith.constant 0 : index
    %c0_24 = arith.constant 0 : index
    %35 = vector.load %arg10[%c0_22, %c0_23, %c0_24] : memref<1x256x16xbf16, #tpu.memory_space<vmem>>, vector<1x256x16xbf16>
    %36 = vector.shape_cast %35 : vector<1x256x16xbf16> to vector<256x16xbf16>
    %37 = vector.shape_cast %34 : vector<256x16xbf16> to vector<1x256x16xbf16>
    tpu.vector_store %arg10[%c0_22, %c0_23, %c0_24], %37 {strides = array<i32>} : memref<1x256x16xbf16, #tpu.memory_space<vmem>>, vector<1x256x16xbf16>,
    %cst_25 = arith.constant dense<0xFF800000> : vector<256xf32>
    %38 = vector.multi_reduction <maximumf>, %33, %cst_25 [1] : vector<256x16xf32> to vector<256xf32>
    %39 = vector.shape_cast %38 : vector<256xf32> to vector<256x1xf32>
    %c0_i32 = arith.constant 0 : i32
    %40 = arith.cmpi eq, %arg2, %c0_i32 : i32
    %41 = arith.extui %40 : i1 to i32
    %c0_i32_26 = arith.constant 0 : i32
    %42 = arith.cmpi ne, %41, %c0_i32_26 : i32
    scf.if %42 {
      %c0_29 = arith.constant 0 : index
      %c0_30 = arith.constant 0 : index
      %c0_31 = arith.constant 0 : index
      %c0_32 = arith.constant 0 : index
      %46 = vector.load %arg11[%c0_29, %c0_30, %c0_31, %c0_32] : memref<1x1x256x1xf32, #tpu.memory_space<vmem>>, vector<1x1x256x1xf32>
      %47 = vector.shape_cast %46 : vector<1x1x256x1xf32> to vector<256x1xf32>
      %48 = vector.shape_cast %39 : vector<256x1xf32> to vector<1x1x256x1xf32>
      tpu.vector_store %arg11[%c0_29, %c0_30, %c0_31, %c0_32], %48 {strides = array<i32>} : memref<1x1x256x1xf32, #tpu.memory_space<vmem>>, vector<1x1x256x1xf32>,
    } else {
    }
    %c0_i32_27 = arith.constant 0 : i32
    %43 = arith.cmpi sgt, %arg2, %c0_i32_27 : i32
    %44 = arith.extui %43 : i1 to i32
    %c0_i32_28 = arith.constant 0 : i32
    %45 = arith.cmpi ne, %44, %c0_i32_28 : i32
    scf.if %45 {
      %c0_29 = arith.constant 0 : index
      %c0_30 = arith.constant 0 : index
      %c0_31 = arith.constant 0 : index
      %c0_32 = arith.constant 0 : index
      %46 = vector.load %arg11[%c0_29, %c0_30, %c0_31, %c0_32] : memref<1x1x256x1xf32, #tpu.memory_space<vmem>>, vector<1x1x256x1xf32>
      %47 = vector.shape_cast %46 : vector<1x1x256x1xf32> to vector<256x1xf32>
      %48 = arith.maximumf %47, %39 : vector<256x1xf32>
      %c0_33 = arith.constant 0 : index
      %c0_34 = arith.constant 0 : index
      %c0_35 = arith.constant 0 : index
      %c0_36 = arith.constant 0 : index
      %49 = vector.load %arg11[%c0_33, %c0_34, %c0_35, %c0_36] : memref<1x1x256x1xf32, #tpu.memory_space<vmem>>, vector<1x1x256x1xf32>
      %50 = vector.shape_cast %49 : vector<1x1x256x1xf32> to vector<256x1xf32>
      %51 = vector.shape_cast %48 : vector<256x1xf32> to vector<1x1x256x1xf32>
      tpu.vector_store %arg11[%c0_33, %c0_34, %c0_35, %c0_36], %51 {strides = array<i32>} : memref<1x1x256x1xf32, #tpu.memory_space<vmem>>, vector<1x1x256x1xf32>,
    } else {
    }
    return
  }
  func.func @transform_0(%arg0: i32, %arg1: i32, %arg2: i32) -> (i32, i32, i32) {
    %c1_i32 = arith.constant 1 : i32
    %0 = arith.muli %arg0, %c1_i32 : i32
    %1 = arith.addi %0, %arg2 : i32
    %c0_i32 = arith.constant 0 : i32
    %c0_i32_0 = arith.constant 0 : i32
    return %arg1, %c0_i32, %1 : i32, i32, i32
  }
  func.func @transform_1(%arg0: i32, %arg1: i32, %arg2: i32) -> (i32, i32) {
    %c0_i32 = arith.constant 0 : i32
    %c0_i32_0 = arith.constant 0 : i32
    %c0_i32_1 = arith.constant 0 : i32
    return %c0_i32, %c0_i32_0 : i32, i32
  }
  func.func @transform_2(%arg0: i32, %arg1: i32, %arg2: i32) -> (i32, i32) {
    %c0_i32 = arith.constant 0 : i32
    %c0_i32_0 = arith.constant 0 : i32
    %c0_i32_1 = arith.constant 0 : i32
    return %c0_i32, %c0_i32_0 : i32, i32
  }
  func.func @transform_3(%arg0: i32, %arg1: i32, %arg2: i32) -> (i32, i32) {
    %c0_i32 = arith.constant 0 : i32
    %c0_i32_0 = arith.constant 0 : i32
    %c0_i32_1 = arith.constant 0 : i32
    return %c0_i32, %c0_i32_0 : i32, i32
  }
  func.func @transform_4(%arg0: i32, %arg1: i32, %arg2: i32) -> (i32, i32) {
    %c0_i32 = arith.constant 0 : i32
    %c0_i32_0 = arith.constant 0 : i32
    %c0_i32_1 = arith.constant 0 : i32
    return %c0_i32, %c0_i32_0 : i32, i32
  }
  func.func @transform_5(%arg0: i32, %arg1: i32, %arg2: i32) -> (i32, i32) {
    %c0_i32 = arith.constant 0 : i32
    %c0_i32_0 = arith.constant 0 : i32
    %c0_i32_1 = arith.constant 0 : i32
    return %c0_i32, %c0_i32_0 : i32, i32
  }
  func.func @transform_6(%arg0: i32, %arg1: i32, %arg2: i32) -> (i32, i32) {
    %c0_i32 = arith.constant 0 : i32
    %c0_i32_0 = arith.constant 0 : i32
    %c0_i32_1 = arith.constant 0 : i32
    return %c0_i32, %c0_i32_0 : i32, i32
  }
  func.func @transform_7(%arg0: i32, %arg1: i32, %arg2: i32) -> (i32, i32, i32) {
    %c1_i32 = arith.constant 1 : i32
    %0 = arith.muli %arg0, %c1_i32 : i32
    %1 = arith.addi %0, %arg2 : i32
    %c0_i32 = arith.constant 0 : i32
    %c0_i32_0 = arith.constant 0 : i32
    return %arg1, %c0_i32, %1 : i32, i32, i32
  }
  func.func @transform_8(%arg0: i32, %arg1: i32, %arg2: i32) -> (i32, i32, i32, i32) {
    %c0_i32 = arith.constant 0 : i32
    %c0_i32_0 = arith.constant 0 : i32
    %c0_i32_1 = arith.constant 0 : i32
    return %arg0, %arg1, %c0_i32, %c0_i32_0 : i32, i32, i32, i32
  }
}

</mosaic_0001>

<bundles_post_ra>
// kernel: pointnet_forward.1
= control target key start
LH: loop header
LB: loop body
LE: loop exit
PB: predicated region body
PF: predicated region fallthrough
CT: control target
= control target key end

     0   :  { %s2035_s27 = smov 0   ;;  %s2037_s28 = smov 0   ;;  %s2553_s0 = inlined_call_operand.vmem [shape: bf16[2,8,16], index: 0, kind: input, shape index: {}]   ;;  %s2554_s1 = inlined_call_operand.vmem [shape: bf16[64,8], index: 1, kind: input, shape index: {}]   ;;  %s2555_s2 = inlined_call_operand.vmem [shape: f32[64,1], index: 2, kind: input, shape index: {}]   ;;  %s2556_s3 = inlined_call_operand.vmem [shape: bf16[128,64], index: 3, kind: input, shape index: {}]   ;;  %s2557_s4 = inlined_call_operand.vmem [shape: f32[128,1], index: 4, kind: input, shape index: {}]   ;;  %s2558_s5 = inlined_call_operand.vmem [shape: bf16[256,128], index: 5, kind: input, shape index: {}]   ;;  %s2559_s6 = inlined_call_operand.vmem [shape: f32[256,1], index: 6, kind: input, shape index: {}]   ;;  %s2560_s7 = inlined_call_operand.vmem [shape: bf16[2,256,16], index: 7, kind: output, shape index: {0}]   ;;  %s2561_s8 = inlined_call_operand.vmem [shape: f32[1,2,256,1], index: 8, kind: output, shape index: {1}]  }
   0x1   :  { %s2039_s29 = smov 0  }
   0x2 LB: > { %s34_s30 = sadd.s32 1, %s1983_s28  ;;  %p1759_p0 = scmp.ge.s32.totalorder %s1987_s29, 1  ;;  %s1987_s29 = sphi %s2039_s29, %s19_s29   ;;  %s1983_s28 = sphi %s2037_s28, %s2563_s28   ;;  %s1979_s27 = sphi %s2035_s27, %s2562_s27  }
   0x3   : > { %p36_p1 = scmp.ge.s32.totalorder %s34_s30, 2  ;;  %p298_p2 = scmp.lt.s32.totalorder %s1987_s29, 3 }
   0x5   : > { %s2565_s30 = smov (%p36_p1, %s34_s30), 0  ;;  %p299_p3 = pnand %p1759_p0, %p298_p2 }
   0x6   : > { %p349_p4 = scmp.lt.s32.totalorder (!%p299_p3), %s1979_s27, 1 }
   0x7   : > { %302 = sbr.rel (%p299_p3) target bundleno = 875 (0x36b), region = 48 }
   0xc   : > { %v392_v0 = vld [vmem:[%s2555_s2 + $0x30] sm:$0xff]  ;;  %v390_v1 = vld [vmem:[%s2555_s2 + $0x20] sm:$0xff]  ;;  %v1989_v3 = vmov 0   ;;  %s2567_s27 = smov (!%p349_p4, %s1979_s27), 1  ;;  %vm467_vm0 = vcmask 1043456   ;;  %v391_v6 = vld [vmem:[%s2555_s2 + $0x28] sm:$0xff] }
   0xd   : > { %v388_v2 = vld [vmem:[%s2555_s2 + $0x10] sm:$0xff]  ;;  %1964 = vset.pattern.permute.xlu2 %v1989_v3  ;;  %1963 = vset.pattern.permute.xlu1 %v1989_v3  ;;  %s1760_s15 = sshll.u32 %s2567_s27, 2  ;;  %v393_v7 = vld [vmem:[%s2555_s2 + $0x38] sm:$0xff]  ;;  %v1893_v9 = vld [vmem:[%s2554_s1] sm:$0xff]  ;;  %vm454_vm1 = vcmask 64512   ;;  %vm680_vm10 = vcmask 523264  }
   0xe   : > { %1962 = vset.pattern.permute.xlu0 %v1989_v3  ;;  %416 = vperm.xlu1 %1963, %v390_v1   ;;  %s355_s18 = scalar_lea.vmem %s2553_s0, %s1760_s15  ;;  %v389_v8 = vld [vmem:[%s2555_s2 + $0x18] sm:$0xff]  ;;  %v387_v10 = vld [vmem:[%s2555_s2 + $0x8] sm:$0xff]  ;;  %v544_v11 = vld [vmem:[%s2557_s4] sm:$0xff]  ;;  %s1891_s19 = sshll.u32 %s2567_s27, 7 }
   0xf   : > { %426 = vperm.xlu0 %1962, %v392_v0   ;;  %406 = vperm.xlu2 %1964, %v388_v2   ;;  %v377_v4 = vld [vmem:[%s355_s18] sm:$0xf]  ;;  %v546_v13 = vld [vmem:[%s2557_s4 + $0x10] sm:$0xff]  ;;  %v547_v14 = vld [vmem:[%s2557_s4 + $0x18] sm:$0xff]  ;;  %s2358_s22 = scalar_lea.vmem %s2560_s7, %s1891_s19  ;;  %s1892_s23 = sshll.u32 %s2567_s27, 8 }
  0x10   : > { %v469_v5 = vsel %vm467_vm0, %v377_v4, 0  ;;  %v386_v12 = vld [vmem:[%s2555_s2] sm:$0xff]  ;;  %v545_v15 = vld [vmem:[%s2557_s4 + $0x8] sm:$0xff]  ;;  %v558_v18 = vld [vmem:[%s2557_s4 + $0x70] sm:$0xff]  ;;  %s2477_s26 = scalar_lea.vmem %s2561_s8, %s1892_s23 }
  0x11   : > { %478 = vmatpush.bf16.msra.mxu0 %v469_v5  ;;  %v1894_v16 = vld [vmem:[%s2554_s1 + $0x8] sm:$0xff]  ;;  %v548_v19 = vld [vmem:[%s2557_s4 + $0x20] sm:$0xff]  ;;  %v559_v22 = vld [vmem:[%s2557_s4 + $0x78] sm:$0xff] }
  0x12   : > { %v549_v17 = vld [vmem:[%s2557_s4 + $0x28] sm:$0xff]  ;;  %v556_v20 = vld [vmem:[%s2557_s4 + $0x60] sm:$0xff]  ;;  %v1895_v23 = vld [vmem:[%s2554_s1 + $0x10] sm:$0xff] }
  0x13   : > { %v557_v21 = vld [vmem:[%s2557_s4 + $0x68] sm:$0xff]  ;;  %v555_v24 = vld [vmem:[%s2557_s4 + $0x58] sm:$0xff]  ;;  %v552_v25 = vld [vmem:[%s2557_s4 + $0x40] sm:$0xff] }
  0x14   : > { %1781 = vmatmul.msk.bf16.vlgmr.msra.gmra.mxu0 %vm454_vm1, %v1893_v9  ;;  %v554_v26 = vld [vmem:[%s2557_s4 + $0x50] sm:$0xff]  ;;  %v551_v28 = vld [vmem:[%s2557_s4 + $0x38] sm:$0xff]  ;;  %v553_v29 = vld [vmem:[%s2557_s4 + $0x48] sm:$0xff] }
  0x15   : > { %v550_v27 = vld [vmem:[%s2557_s4 + $0x30] sm:$0xff]  ;;  %v1896_v30 = vld [vmem:[%s2554_s1 + $0x18] sm:$0xff]  ;;  %v843_v31 = vld [vmem:[%s2559_s6 + $0x8] sm:$0xff] }
  0x16   : > { %421 = vperm.xlu1 %1963, %v391_v6   ;;  %v844_v32 = vld [vmem:[%s2559_s6 + $0x10] sm:$0xff]  ;;  %v842_v33 = vld [vmem:[%s2559_s6] sm:$0xff]  ;;  %v847_v35 = vld [vmem:[%s2559_s6 + $0x28] sm:$0xff] }
  0x17   : > { %431 = vperm.xlu0 %1962, %v393_v7   ;;  %411 = vperm.xlu2 %1964, %v389_v8   ;;  %v846_v34 = vld [vmem:[%s2559_s6 + $0x20] sm:$0xff]  ;;  %v845_v36 = vld [vmem:[%s2559_s6 + $0x18] sm:$0xff]  ;;  %v848_v39 = vld [vmem:[%s2559_s6 + $0x30] sm:$0xff] }
  0x18   : > { %v849_v37 = vld [vmem:[%s2559_s6 + $0x38] sm:$0xff]  ;;  %v850_v38 = vld [vmem:[%s2559_s6 + $0x40] sm:$0xff]  ;;  %v852_v40 = vld [vmem:[%s2559_s6 + $0x50] sm:$0xff] }
  0x19   : > { %v853_v41 = vld [vmem:[%s2559_s6 + $0x58] sm:$0xff]  ;;  %v851_v42 = vld [vmem:[%s2559_s6 + $0x48] sm:$0xff]  ;;  %v856_v44 = vld [vmem:[%s2559_s6 + $0x70] sm:$0xff] }
  0x1a   : > { %v855_v43 = vld [vmem:[%s2559_s6 + $0x68] sm:$0xff]  ;;  %v854_v45 = vld [vmem:[%s2559_s6 + $0x60] sm:$0xff]  ;;  %v857_v48 = vld [vmem:[%s2559_s6 + $0x78] sm:$0xff] }
  0x1b   : > { %v858_v46 = vld [vmem:[%s2559_s6 + $0x80] sm:$0xff]  ;;  %v859_v47 = vld [vmem:[%s2559_s6 + $0x88] sm:$0xff]  ;;  %v861_v49 = vld [vmem:[%s2559_s6 + $0x98] sm:$0xff] }
  0x1c   : > { %v862_v50 = vld [vmem:[%s2559_s6 + $0xa0] sm:$0xff]  ;;  %v860_v51 = vld [vmem:[%s2559_s6 + $0x90] sm:$0xff]  ;;  %v865_v53 = vld [vmem:[%s2559_s6 + $0xb8] sm:$0xff] }
  0x1d   : > { %v864_v52 = vld [vmem:[%s2559_s6 + $0xb0] sm:$0xff]  ;;  %v863_v54 = vld [vmem:[%s2559_s6 + $0xa8] sm:$0xff]  ;;  %v866_v57 = vld [vmem:[%s2559_s6 + $0xc0] sm:$0xff] }
  0x1e   : > { %401 = vperm.xlu1 %1963, %v387_v10   ;;  %v867_v55 = vld [vmem:[%s2559_s6 + $0xc8] sm:$0xff]  ;;  %v868_v56 = vld [vmem:[%s2559_s6 + $0xd0] sm:$0xff]  ;;  %v870_v58 = vld [vmem:[%s2559_s6 + $0xe0] sm:$0xff] }
  0x1f   : > { %562 = vperm.xlu2 %1964, %v544_v11   ;;  %396 = vperm.xlu0 %1962, %v386_v12   ;;  %v871_v59 = vld [vmem:[%s2559_s6 + $0xe8] sm:$0xff]  ;;  %v869_v60 = vld [vmem:[%s2559_s6 + $0xd8] sm:$0xff]  ;;  %v872_v63 = vld [vmem:[%s2559_s6 + $0xf0] sm:$0xff] }
  0x20   : > { %v873_v62 = vld [vmem:[%s2559_s6 + $0xf8] sm:$0xff] }
  0x24   : > { %1782 = vmatmul.msk.bf16.gmra.mxu0 %vm454_vm1, %v1894_v16 }
  0x26   : > { %572 = vperm.xlu1 %1963, %v546_v13  }
  0x27   : > { %577 = vperm.xlu2 %1964, %v547_v14   ;;  %567 = vperm.xlu0 %1962, %v545_v15  }
  0x2e   : > { %587 = vperm.xlu1 %1963, %v549_v17  }
  0x2f   : > { %632 = vperm.xlu2 %1964, %v558_v18   ;;  %582 = vperm.xlu0 %1962, %v548_v19  }
  0x34   : > { %1783 = vmatmul.msk.bf16.gmra.mxu0 %vm454_vm1, %v1895_v23 }
  0x36   : > { %622 = vperm.xlu1 %1963, %v556_v20  }
  0x37   : > { %627 = vperm.xlu2 %1964, %v557_v21   ;;  %637 = vperm.xlu0 %1962, %v559_v22  }
  0x3e   : > { %617 = vperm.xlu1 %1963, %v555_v24  }
  0x3f   : > { %602 = vperm.xlu2 %1964, %v552_v25   ;;  %612 = vperm.xlu0 %1962, %v554_v26  }
  0x44   : > { %1784 = vmatmul.msk.bf16.gmra.mxu0 %vm454_vm1, %v1896_v30 }
  0x46   : > { %592 = vperm.xlu1 %1963, %v550_v27  }
  0x47   : > { %597 = vperm.xlu2 %1964, %v551_v28   ;;  %607 = vperm.xlu0 %1962, %v553_v29  }
  0x4e   : > { %881 = vperm.xlu1 %1963, %v843_v31  }
  0x4f   : > { %886 = vperm.xlu2 %1964, %v844_v32   ;;  %876 = vperm.xlu0 %1962, %v842_v33  }
  0x56   : > { %896 = vperm.xlu1 %1963, %v846_v34  }
  0x57   : > { %901 = vperm.xlu2 %1964, %v847_v35   ;;  %891 = vperm.xlu0 %1962, %v845_v36  }
  0x5e   : > { %911 = vperm.xlu1 %1963, %v849_v37  }
  0x5f   : > { %916 = vperm.xlu2 %1964, %v850_v38   ;;  %906 = vperm.xlu0 %1962, %v848_v39  }
  0x66   : > { %926 = vperm.xlu1 %1963, %v852_v40  }
  0x67   : > { %931 = vperm.xlu2 %1964, %v853_v41   ;;  %921 = vperm.xlu0 %1962, %v851_v42  }
  0x69   : > { %v407_v7 = vpop.permute.xlu2 %406 }
  0x6e   : > { %941 = vperm.xlu1 %1963, %v855_v43   ;;  %v1897_v43 = vld [vmem:[%s2556_s3] sm:$0xff] }
  0x6f   : > { %946 = vperm.xlu2 %1964, %v856_v44   ;;  %936 = vperm.xlu0 %1962, %v854_v45   ;;  %v1898_v44 = vld [vmem:[%s2556_s3 + $0x8] sm:$0xff]  ;;  %v1899_v45 = vld [vmem:[%s2556_s3 + $0x10] sm:$0xff] }
  0x71   : > { %v412_v17 = vpop.permute.xlu2 %411 }
  0x76   : > { %956 = vperm.xlu1 %1963, %v858_v46   ;;  %v1900_v46 = vld [vmem:[%s2556_s3 + $0x18] sm:$0xff] }
  0x77   : > { %961 = vperm.xlu2 %1964, %v859_v47   ;;  %951 = vperm.xlu0 %1962, %v857_v48   ;;  %v1901_v47 = vld [vmem:[%s2556_s3 + $0x20] sm:$0xff]  ;;  %v1902_v48 = vld [vmem:[%s2556_s3 + $0x28] sm:$0xff] }
  0x7e   : > { %971 = vperm.xlu1 %1963, %v861_v49   ;;  %v1903_v49 = vld [vmem:[%s2556_s3 + $0x30] sm:$0xff] }
  0x7f   : > { %976 = vperm.xlu2 %1964, %v862_v50   ;;  %966 = vperm.xlu0 %1962, %v860_v51   ;;  %v1904_v50 = vld [vmem:[%s2556_s3 + $0x38] sm:$0xff] }
  0x80   : > { %v417_v5 = vpop.permute.xlu1 %416 }
  0x81   : > { %v427_v6 = vpop.permute.xlu0 %426 }
  0x86   : > { %986 = vperm.xlu1 %1963, %v864_v52   ;;  %v563_v52 = vpop.permute.xlu2 %562 }
  0x87   : > { %991 = vperm.xlu2 %1964, %v865_v53   ;;  %981 = vperm.xlu0 %1962, %v863_v54  }
  0x88   : > { %v422_v9 = vpop.permute.xlu1 %421 }
  0x89   : > { %v432_v11 = vpop.permute.xlu0 %431 }
  0x8e   : > { %1001 = vperm.xlu1 %1963, %v867_v55  }
  0x8f   : > { %1006 = vperm.xlu2 %1964, %v868_v56   ;;  %996 = vperm.xlu0 %1962, %v866_v57  }
  0x90   : > { %v402_v25 = vpop.permute.xlu1 %401 }
  0x91   : > { %v480_v61 = vpop.f32.mrf.mxu0  ;;  %v397_v30 = vpop.permute.xlu0 %396 }
  0x92   : > { %v481_v31 = vadd.f32 %v480_v61, %v397_v30 }
  0x94   : > { %v508_v37 = vmul.f32 0.01, %v481_v31  ;;  %vm500_vm9 = vcmp.gt.f32.partialorder %v481_v31, 0.0 }
  0x96   : > { %1016 = vperm.xlu1 %1963, %v870_v58   ;;  %v516_v41 = vsel %vm500_vm9, %v481_v31, %v508_v37 }
  0x97   : > { %1021 = vperm.xlu2 %1964, %v871_v59   ;;  %1011 = vperm.xlu0 %1962, %v869_v60  }
  0x98   : > { %v573_v59 = vpop.permute.xlu1 %572 }
  0x99   : > { %v482_v0 = vpop.f32.mrf.mxu0  ;;  %v568_v54 = vpop.permute.xlu0 %567 }
  0x9a   : > { %v483_v27 = vadd.f32 %v482_v0, %v402_v25 }
  0x9c   : > { %v509_v35 = vmul.f32 0.01, %v483_v27  ;;  %vm501_vm8 = vcmp.gt.f32.partialorder %v483_v27, 0.0 }
  0x9e   : > { %1031 = vperm.xlu1 %1963, %v873_v62   ;;  %v517_v40 = vsel %vm501_vm8, %v483_v27, %v509_v35 }
  0x9f   : > { %1026 = vperm.xlu0 %1962, %v872_v63   ;;  %v540_v42 = vpack.c.bf16 %v517_v40, %v516_v41  ;;  %v578_v63 = vpop.permute.xlu2 %577 }
  0xa1   : > { %v485_v1 = vpop.f32.mrf.mxu0 }
  0xa2   : > { %v486_v21 = vadd.f32 %v485_v1, %v407_v7 }
  0xa4   : > { %v510_v32 = vmul.f32 0.01, %v486_v21  ;;  %vm502_vm7 = vcmp.gt.f32.partialorder %v486_v21, 0.0 }
  0xa6   : > { %v518_v38 = vsel %vm502_vm7, %v486_v21, %v510_v32 }
  0xa9   : > { %v487_v2 = vpop.f32.mrf.mxu0 }
  0xaa   : > { %v488_v18 = vadd.f32 %v487_v2, %v412_v17  ;;  %v588_v2 = vpop.permute.xlu1 %587 }
  0xac   : > { %v511_v28 = vmul.f32 0.01, %v488_v18  ;;  %vm503_vm6 = vcmp.gt.f32.partialorder %v488_v18, 0.0 }
  0xae   : > { %v519_v36 = vsel %vm503_vm6, %v488_v18, %v511_v28 }
  0xaf   : > { %v541_v39 = vpack.c.bf16 %v519_v36, %v518_v38 }
  0xb1   : > { %v490_v3 = vpop.f32.mrf.mxu0 }
  0xb2   : > { %v491_v14 = vadd.f32 %v490_v3, %v417_v5 }
  0xb4   : > { %v512_v22 = vmul.f32 0.01, %v491_v14  ;;  %vm504_vm5 = vcmp.gt.f32.partialorder %v491_v14, 0.0 }
  0xb6   : > { %v520_v33 = vsel %vm504_vm5, %v491_v14, %v512_v22  ;;  %v583_v14 = vpop.permute.xlu0 %582 }
  0xb9   : > { %v492_v4 = vpop.f32.mrf.mxu0 }
  0xba   : > { %v493_v12 = vadd.f32 %v492_v4, %v422_v9 }
  0xbc   : > { %v513_v19 = vmul.f32 0.01, %v493_v12  ;;  %vm505_vm4 = vcmp.gt.f32.partialorder %v493_v12, 0.0 }
  0xbe   : > { %v521_v29 = vsel %vm505_vm4, %v493_v12, %v513_v19 }
  0xbf   : > { %v542_v34 = vpack.c.bf16 %v521_v29, %v520_v33 }
  0xc1   : > { %v495_v8 = vpop.f32.mrf.mxu0 }
  0xc2   : > { %v496_v10 = vadd.f32 %v495_v8, %v427_v6  ;;  %v633_v6 = vpop.permute.xlu2 %632 }
  0xc4   : > { %v514_v15 = vmul.f32 0.01, %v496_v10  ;;  %vm506_vm2 = vcmp.gt.f32.partialorder %v496_v10, 0.0 }
  0xc6   : > { %v522_v23 = vsel %vm506_vm2, %v496_v10, %v514_v15 }
  0xc9   : > { %v497_v13 = vpop.f32.mrf.mxu0 }
  0xca   : > { %v498_v16 = vadd.f32 %v497_v13, %v432_v11  ;;  %v623_v11 = vpop.permute.xlu1 %622  ;;  %v628_v13 = vpop.permute.xlu2 %627 }
  0xcc   : > { %v515_v20 = vmul.f32 0.01, %v498_v16  ;;  %vm507_vm3 = vcmp.gt.f32.partialorder %v498_v16, 0.0 }
  0xce   : > { %v523_v24 = vsel %vm507_vm3, %v498_v16, %v515_v20 }
  0xcf   : > { %v543_v26 = vpack.c.bf16 %v523_v24, %v522_v23 }
  0xd1   : > { %709 = vmatpush.bf16.msra.mxu1 %v543_v26 }
  0xd2   : > { %v618_v19 = vpop.permute.xlu1 %617  ;;  %v603_v23 = vpop.permute.xlu2 %602 }
  0xd5   : > { %710 = vmatpush.bf16.msra.mxu1 %v542_v34 }
  0xd9   : > { %711 = vmatpush.bf16.msra.mxu1 %v541_v39 }
  0xda   : > { %v593_v26 = vpop.permute.xlu1 %592  ;;  %v598_v28 = vpop.permute.xlu2 %597 }
  0xdd   : > { %712 = vmatpush.bf16.msra.mxu1 %v540_v42  ;;  %v638_v42 = vpop.permute.xlu0 %637 }
  0xe0   : > { %1817 = vmatmul.msk.bf16.vlgmr.msra.gmra.mxu1 %vm680_vm10, %v1897_v43 }
  0xf0   : > { %1818 = vmatmul.msk.bf16.gmra.mxu1 %vm680_vm10, %v1898_v44  ;;  %v613_v44 = vpop.permute.xlu0 %612 }
 0x100   : > { %1819 = vmatmul.msk.bf16.gmra.mxu1 %vm680_vm10, %v1899_v45 }
 0x110   : > { %1820 = vmatmul.msk.bf16.gmra.mxu1 %vm680_vm10, %v1900_v46 }
 0x120   : > { %1821 = vmatmul.msk.bf16.gmra.mxu1 %vm680_vm10, %v1901_v47 }
 0x130   : > { %1822 = vmatmul.msk.bf16.gmra.mxu1 %vm680_vm10, %v1902_v48 }
 0x140   : > { %1823 = vmatmul.msk.bf16.gmra.mxu1 %vm680_vm10, %v1903_v49 }
 0x150   : > { %1824 = vmatmul.msk.bf16.gmra.mxu1 %vm680_vm10, %v1904_v50 }
 0x15d   : > { %v714_v51 = vpop.f32.mrf.mxu1 }
 0x15e   : > { %v715_v53 = vadd.f32 %v714_v51, %v563_v52 }
 0x160   : > { %v770_v56 = vmul.f32 0.01, %v715_v53  ;;  %vm754_vm11 = vcmp.gt.f32.partialorder %v715_v53, 0.0 }
 0x162   : > { %v786_v60 = vsel %vm754_vm11, %v715_v53, %v770_v56 }
 0x165   : > { %v716_v55 = vpop.f32.mrf.mxu1 }
 0x166   : > { %v717_v57 = vadd.f32 %v716_v55, %v568_v54 }
 0x168   : > { %vm755_vm12 = vcmp.gt.f32.partialorder %v717_v57, 0.0  ;;  %v771_v58 = vmul.f32 0.01, %v717_v57 }
 0x16a   : > { %v787_v61 = vsel %vm755_vm12, %v717_v57, %v771_v58  ;;  %v608_v58 = vpop.permute.xlu0 %607  ;;  %vm1380_vm12 = vcmask 130048  }
 0x16b   : > { %v2267_v62 = vpack.c.bf16 %v787_v61, %v786_v60 }
 0x16d   : > { %v719_v0 = vpop.f32.mrf.mxu1 }
 0x16e   : > { %v720_v1 = vadd.f32 %v719_v0, %v573_v59 }
 0x170   : > { %v772_v4 = vmul.f32 0.01, %v720_v1  ;;  %vm756_vm13 = vcmp.gt.f32.partialorder %v720_v1, 0.0 }
 0x172   : > { %v788_v8 = vsel %vm756_vm13, %v720_v1, %v772_v4  ;;  %vm1347_vm13 = vcmask 125952  }
 0x175   : > { %v721_v3 = vpop.f32.mrf.mxu1 }
 0x176   : > { %v722_v5 = vadd.f32 %v721_v3, %v578_v63 }
 0x178   : > { %vm757_vm14 = vcmp.gt.f32.partialorder %v722_v5, 0.0  ;;  %v773_v7 = vmul.f32 0.01, %v722_v5 }
 0x17a   : > { %v789_v9 = vsel %vm757_vm14, %v722_v5, %v773_v7 }
 0x17b   : > { %v2269_v10 = vpack.c.bf16 %v789_v9, %v788_v8 }
 0x17d   : > { %v724_v12 = vpop.f32.mrf.mxu1 }
 0x17e   : > { %v725_v15 = vadd.f32 %v724_v12, %v583_v14  ;;  %v1907_v14 = vld [vmem:[%s2558_s5 + $0x10] sm:$0xff] }
 0x180   : > { %v774_v17 = vmul.f32 0.01, %v725_v15  ;;  %vm758_vm15 = vcmp.gt.f32.partialorder %v725_v15, 0.0 }
 0x182   : > { %v790_v21 = vsel %vm758_vm15, %v725_v15, %v774_v17  ;;  %v1914_v15 = vld [vmem:[%s2558_s5 + $0x48] sm:$0xff]  ;;  %v1915_v17 = vld [vmem:[%s2558_s5 + $0x50] sm:$0xff] }
 0x185   : > { %v726_v16 = vpop.f32.mrf.mxu1 }
 0x186   : > { %v727_v18 = vadd.f32 %v726_v16, %v588_v2  ;;  %v1908_v16 = vld [vmem:[%s2558_s5 + $0x18] sm:$0xff] }
 0x188   : > { %vm759_vm0 = vcmp.gt.f32.partialorder %v727_v18, 0.0  ;;  %v775_v20 = vmul.f32 0.01, %v727_v18 }
 0x18a   : > { %v791_v22 = vsel %vm759_vm0, %v727_v18, %v775_v20  ;;  %v1916_v18 = vld [vmem:[%s2558_s5 + $0x58] sm:$0xff]  ;;  %v1917_v20 = vld [vmem:[%s2558_s5 + $0x60] sm:$0xff] }
 0x18b   : > { %v2271_v24 = vpack.c.bf16 %v791_v22, %v790_v21  ;;  %v1911_v21 = vld [vmem:[%s2558_s5 + $0x30] sm:$0xff]  ;;  %v1918_v22 = vld [vmem:[%s2558_s5 + $0x68] sm:$0xff] }
 0x18d   : > { %v729_v25 = vpop.f32.mrf.mxu1 }
 0x18e   : > { %v730_v27 = vadd.f32 %v729_v25, %v593_v26  ;;  %v1919_v25 = vld [vmem:[%s2558_s5 + $0x70] sm:$0xff]  ;;  %v882_v26 = vpop.permute.xlu1 %881 }
 0x190   : > { %v776_v30 = vmul.f32 0.01, %v730_v27  ;;  %vm760_vm1 = vcmp.gt.f32.partialorder %v730_v27, 0.0 }
 0x192   : > { %v792_v33 = vsel %vm760_vm1, %v730_v27, %v776_v30 }
 0x195   : > { %v731_v29 = vpop.f32.mrf.mxu1 }
 0x196   : > { %v732_v31 = vadd.f32 %v731_v29, %v598_v28  ;;  %v2326_v28 = vpop.permute.xlu2 %886  ;;  %v897_v29 = vpop.permute.xlu1 %896 }
 0x198   : > { %vm761_vm2 = vcmp.gt.f32.partialorder %v732_v31, 0.0  ;;  %v777_v32 = vmul.f32 0.01, %v732_v31 }
 0x19a   : > { %v793_v34 = vsel %vm761_vm2, %v732_v31, %v777_v32  ;;  %v1913_v31 = vld [vmem:[%s2558_s5 + $0x40] sm:$0xff]  ;;  %v1920_v32 = vld [vmem:[%s2558_s5 + $0x78] sm:$0xff] }
 0x19b   : > { %v837_v35 = vpack.c.bf16 %v793_v34, %v792_v33 }
 0x19d   : > { %v734_v36 = vpop.f32.mrf.mxu1 }
 0x19e   : > { %v735_v0 = vadd.f32 %v734_v36, %v603_v23  ;;  %v877_v23 = vpop.permute.xlu0 %876  ;;  %v902_v33 = vpop.permute.xlu2 %901 }
 0x19f   : > { %v2336_v34 = vpop.permute.xlu1 %911 }
 0x1a0   : > { %vm762_vm10 = vcmp.gt.f32.partialorder %v735_v0, 0.0 }
 0x1a5   : > { %v736_v37 = vpop.f32.mrf.mxu1 }
 0x1a6   : > { %v737_v60 = vadd.f32 %v736_v37, %v608_v58  ;;  %v2324_v27 = vpop.permute.xlu0 %891  ;;  %v2340_v36 = vpop.permute.xlu2 %916 }
 0x1a7   : > { %v2342_v37 = vpop.permute.xlu1 %926 }
 0x1a8   : > { %v779_v4 = vmul.f32 0.01, %v737_v60  ;;  %vm763_vm9 = vcmp.gt.f32.partialorder %v737_v60, 0.0 }
 0x1aa   : > { %v795_v9 = vsel %vm763_vm9, %v737_v60, %v779_v4 }
 0x1ad   : > { %v739_v38 = vpop.f32.mrf.mxu1 }
 0x1ae   : > { %v740_v54 = vadd.f32 %v739_v38, %v613_v44  ;;  %v2328_v30 = vpop.permute.xlu0 %906 }
 0x1b0   : > { %v780_v1 = vmul.f32 0.01, %v740_v54  ;;  %vm764_vm8 = vcmp.gt.f32.partialorder %v740_v54, 0.0 }
 0x1b2   : > { %v796_v7 = vsel %vm764_vm8, %v740_v54, %v780_v1 }
 0x1b5   : > { %v741_v39 = vpop.f32.mrf.mxu1 }
 0x1b6   : > { %v742_v51 = vadd.f32 %v741_v39, %v618_v19  ;;  %v1910_v19 = vld [vmem:[%s2558_s5 + $0x28] sm:$0xff]  ;;  %v2346_v39 = vpop.permute.xlu2 %931 }
 0x1b8   : > { %v781_v61 = vmul.f32 0.01, %v742_v51  ;;  %vm765_vm7 = vcmp.gt.f32.partialorder %v742_v51, 0.0 }
 0x1ba   : > { %v797_v5 = vsel %vm765_vm7, %v742_v51, %v781_v61 }
 0x1bb   : > { %v839_v8 = vpack.c.bf16 %v797_v5, %v796_v7 }
 0x1bd   : > { %v744_v40 = vpop.f32.mrf.mxu1 }
 0x1be   : > { %v745_v48 = vadd.f32 %v744_v40, %v623_v11  ;;  %v2348_v40 = vpop.permute.xlu1 %941  ;;  %v2353_v44 = vpop.permute.xlu2 %946 }
 0x1c0   : > { %v782_v55 = vmul.f32 0.01, %v745_v48  ;;  %vm766_vm6 = vcmp.gt.f32.partialorder %v745_v48, 0.0 }
 0x1c2   : > { %v798_v2 = vsel %vm766_vm6, %v745_v48, %v782_v55 }
 0x1c5   : > { %v746_v41 = vpop.f32.mrf.mxu1 }
 0x1c6   : > { %v747_v46 = vadd.f32 %v746_v41, %v628_v13  ;;  %v1905_v13 = vld [vmem:[%s2558_s5] sm:$0xff] }
 0x1c8   : > { %v783_v52 = vmul.f32 0.01, %v747_v46  ;;  %vm767_vm5 = vcmp.gt.f32.partialorder %v747_v46, 0.0 }
 0x1ca   : > { %v799_v63 = vsel %vm767_vm5, %v747_v46, %v783_v52  ;;  %v2360_v46 = vpop.permute.xlu1 %956 }
 0x1cb   : > { %v840_v3 = vpack.c.bf16 %v799_v63, %v798_v2 }
 0x1cd   : > { %v749_v43 = vpop.f32.mrf.mxu1 }
 0x1ce   : > { %v750_v45 = vadd.f32 %v749_v43, %v633_v6  ;;  %v778_v6 = vmul.f32 0.01, %v735_v0 }
 0x1d0   : > { %v784_v49 = vmul.f32 0.01, %v750_v45  ;;  %vm768_vm3 = vcmp.gt.f32.partialorder %v750_v45, 0.0  ;;  %v794_v11 = vsel %vm762_vm10, %v735_v0, %v778_v6  ;;  %v2365_v0 = vpop.permute.xlu2 %961 }
 0x1d1   : > { %v838_v12 = vpack.c.bf16 %v795_v9, %v794_v11 }
 0x1d2   : > { %v800_v56 = vsel %vm768_vm3, %v750_v45, %v784_v49 }
 0x1d5   : > { %v751_v47 = vpop.f32.mrf.mxu1 }
 0x1d6   : > { %v752_v50 = vadd.f32 %v751_v47, %v638_v42 }
 0x1d8   : > { %vm769_vm4 = vcmp.gt.f32.partialorder %v752_v50, 0.0  ;;  %v785_v53 = vmul.f32 0.01, %v752_v50 }
 0x1da   : > { %v801_v57 = vsel %vm769_vm4, %v752_v50, %v785_v53 }
 0x1db   : > { %v841_v59 = vpack.c.bf16 %v801_v57, %v800_v56 }
 0x1dd   : > { %1130 = vmatpush.bf16.msrb.mxu0 %v841_v59  ;;  %1921 = vmatpush.bf16.msra.mxu2 %v841_v59 }
 0x1de   : > { %1922 = vmatpush.bf16.msra.mxu3 %v841_v59 }
 0x1e1   : > { %1131 = vmatpush.bf16.msrb.mxu0 %v840_v3  ;;  %1923 = vmatpush.bf16.msra.mxu2 %v840_v3 }
 0x1e2   : > { %1924 = vmatpush.bf16.msra.mxu3 %v840_v3 }
 0x1e5   : > { %1132 = vmatpush.bf16.msrb.mxu0 %v839_v8  ;;  %1925 = vmatpush.bf16.msra.mxu2 %v839_v8 }
 0x1e6   : > { %1926 = vmatpush.bf16.msra.mxu3 %v839_v8  ;;  %v972_v8 = vpop.permute.xlu1 %971 }
 0x1e9   : > { %1133 = vmatpush.bf16.msrb.mxu0 %v838_v12  ;;  %1927 = vmatpush.bf16.msra.mxu2 %v838_v12 }
 0x1ea   : > { %1928 = vmatpush.bf16.msra.mxu3 %v838_v12 }
 0x1ed   : > { %1134 = vmatpush.bf16.msrb.mxu0 %v837_v35  ;;  %1929 = vmatpush.bf16.msra.mxu2 %v837_v35 }
 0x1ee   : > { %1930 = vmatpush.bf16.msra.mxu3 %v837_v35  ;;  %v2338_v35 = vpop.permute.xlu0 %921 }
 0x1f1   : > { %1135 = vmatpush.bf16.msrb.mxu0 %v2271_v24  ;;  %1931 = vmatpush.bf16.msra.mxu2 %v2271_v24 }
 0x1f2   : > { %1932 = vmatpush.bf16.msra.mxu3 %v2271_v24  ;;  %v1912_v24 = vld [vmem:[%s2558_s5 + $0x38] sm:$0xff] }
 0x1f5   : > { %1136 = vmatpush.bf16.msrb.mxu0 %v2269_v10  ;;  %1933 = vmatpush.bf16.msra.mxu2 %v2269_v10 }
 0x1f6   : > { %1934 = vmatpush.bf16.msra.mxu3 %v2269_v10  ;;  %v1906_v10 = vld [vmem:[%s2558_s5 + $0x8] sm:$0xff]  ;;  %v2344_v38 = vpop.permute.xlu0 %936 }
 0x1f9   : > { %1137 = vmatpush.bf16.msrb.mxu0 %v2267_v62  ;;  %1935 = vmatpush.bf16.msra.mxu2 %v2267_v62 }
 0x1fa   : > { %1936 = vmatpush.bf16.msra.mxu3 %v2267_v62  ;;  %v1909_v62 = vld [vmem:[%s2558_s5 + $0x20] sm:$0xff] }
 0x1fc   : > { %1138 = vmatmul.bf16.vlgmr.msrb.gmra.mxu0 %v1905_v13  ;;  %1148 = vmatmul.bf16.vlgmr.msra.gmra.mxu2 %v1907_v14 }
 0x1fd   : > { %1183 = vmatmul.bf16.vlgmr.msra.gmra.mxu3 %v1914_v15 }
 0x1fe   : > { %v2350_v41 = vpop.permute.xlu0 %951 }
 0x206   : > { %v967_v51 = vpop.permute.xlu0 %966 }
 0x20c   : > { %1143 = vmatmul.bf16.gmra.mxu0 %v1906_v10  ;;  %1153 = vmatmul.bf16.gmra.mxu2 %v1908_v16 }
 0x20d   : > { %1188 = vmatmul.bf16.gmra.mxu3 %v1915_v17 }
 0x21c   : > { %1158 = vmatmul.bf16.gmra.mxu2 %v1909_v62 }
 0x21d   : > { %1193 = vmatmul.bf16.gmra.mxu3 %v1916_v18 }
 0x22c   : > { %1163 = vmatmul.bf16.gmra.mxu2 %v1910_v19 }
 0x22d   : > { %1198 = vmatmul.bf16.gmra.mxu3 %v1917_v20 }
 0x23c   : > { %1168 = vmatmul.bf16.gmra.mxu2 %v1911_v21 }
 0x23d   : > { %1203 = vmatmul.bf16.gmra.mxu3 %v1918_v22 }
 0x24c   : > { %1173 = vmatmul.bf16.gmra.mxu2 %v1912_v24 }
 0x24d   : > { %1208 = vmatmul.bf16.gmra.mxu3 %v1919_v25  ;;  %v977_v25 = vpop.permute.xlu2 %976 }
 0x25c   : > { %1178 = vmatmul.bf16.gmra.mxu2 %v1913_v31 }
 0x25d   : > { %1213 = vmatmul.bf16.gmra.mxu3 %v1920_v32 }
 0x279   : > { %v1139_v42 = vpop.f32.mrf.mxu0 }
 0x27a   : > { %v1140_v43 = vadd.f32 %v1139_v42, %v877_v23 }
 0x27c   : > { %v1251_v45 = vmul.f32 0.01, %v1140_v43  ;;  %vm1219_vm11 = vcmp.gt.f32.partialorder %v1140_v43, 0.0 }
 0x27e   : > { %v1283_v47 = vsel %vm1219_vm11, %v1140_v43, %v1251_v45 }
 0x27f   : > { %v1149_v48 = vpop.f32.mrf.mxu2  ;;  %v1381_v49 = vsel %vm1380_vm12, %v1283_v47, -inf  ;;  %v1315_v50 = vpack.c.bf16 %v1283_v47, %v1283_v47 }
 0x280   : > { %v1150_v52 = vadd.f32 %v1149_v48, %v897_v29  ;;  %v1184_v53 = vpop.f32.mrf.mxu3  ;;  %1382 = vmax.xlane.f32.xlu2 %v1381_v49 }
 0x281   : > { %v1185_v54 = vadd.f32 %v1184_v53, %v967_v51  ;;  %1348 = vst.msk [vmem:[%s2358_s22] sm:$0xf] %vm1347_vm13, %v1315_v50  ;;  %v1141_v55 = vpop.f32.mrf.mxu0 }
 0x282   : > { %v1255_v56 = vmul.f32 0.01, %v1150_v52  ;;  %v1142_v57 = vadd.f32 %v1141_v55, %v882_v26  ;;  %vm1223_vm14 = vcmp.gt.f32.partialorder %v1150_v52, 0.0  ;;  %v982_v55 = vpop.permute.xlu0 %981 }
 0x283   : > { %v1269_v58 = vmul.f32 0.01, %v1185_v54  ;;  %vm1237_vm15 = vcmp.gt.f32.partialorder %v1185_v54, 0.0 }
 0x284   : > { %v1252_v59 = vmul.f32 0.01, %v1142_v57  ;;  %vm1220_vm0 = vcmp.gt.f32.partialorder %v1142_v57, 0.0  ;;  %v1287_v60 = vsel %vm1223_vm14, %v1150_v52, %v1255_v56 }
 0x285   : > { %v1301_v61 = vsel %vm1237_vm15, %v1185_v54, %v1269_v58  ;;  %v1319_v63 = vpack.c.bf16 %v1287_v60, %v1287_v60  ;;  %v1393_v7 = vsel %vm1380_vm12, %v1287_v60, -inf }
 0x286   : > { %v1435_v1 = vsel %vm1380_vm12, %v1301_v61, -inf  ;;  %v1333_v2 = vpack.c.bf16 %v1301_v61, %v1301_v61  ;;  %v1284_v3 = vsel %vm1220_vm0, %v1142_v57, %v1252_v59 }
 0x287   : > { %1436 = vmax.xlane.f32.xlu1 %v1435_v1  ;;  %v1151_v4 = vpop.f32.mrf.mxu2  ;;  %v1384_v5 = vsel %vm1380_vm12, %v1284_v3, -inf  ;;  %v1316_v6 = vpack.c.bf16 %v1284_v3, %v1284_v3  ;;  %1352 = vst.msk [vmem:[%s2358_s22 + $0x10] sm:$0xf] %vm1347_vm13, %v1319_v63 }
 0x288   : > { %1366 = vst.msk [vmem:[%s2358_s22 + $0x48] sm:$0xf] %vm1347_vm13, %v1333_v2  ;;  %v1152_v9 = vadd.f32 %v1151_v4, %v902_v33  ;;  %v1186_v11 = vpop.f32.mrf.mxu3  ;;  %1385 = vmax.xlane.f32.xlu0 %v1384_v5  ;;  %1394 = vmax.xlane.f32.xlu2 %v1393_v7  ;;  %v987_v4 = vpop.permute.xlu1 %986 }
 0x289   : > { %v1187_v12 = vadd.f32 %v1186_v11, %v972_v8  ;;  %1349 = vst.msk [vmem:[%s2358_s22 + $0x4] sm:$0xf] %vm1347_vm13, %v1316_v6  ;;  %v1144_v13 = vpop.f32.mrf.mxu0 }
 0x28a   : > { %v1256_v14 = vmul.f32 0.01, %v1152_v9  ;;  %v1145_v15 = vadd.f32 %v1144_v13, %v2326_v28  ;;  %vm1224_vm1 = vcmp.gt.f32.partialorder %v1152_v9, 0.0 }
 0x28b   : > { %v1270_v10 = vmul.f32 0.01, %v1187_v12  ;;  %vm1238_vm2 = vcmp.gt.f32.partialorder %v1187_v12, 0.0 }
 0x28c   : > { %v1253_v16 = vmul.f32 0.01, %v1145_v15  ;;  %vm1221_vm3 = vcmp.gt.f32.partialorder %v1145_v15, 0.0  ;;  %v1288_v17 = vsel %vm1224_vm1, %v1152_v9, %v1256_v14 }
 0x28d   : > { %v1320_v62 = vpack.c.bf16 %v1288_v17, %v1288_v17  ;;  %v1302_v18 = vsel %vm1238_vm2, %v1187_v12, %v1270_v10  ;;  %v1396_v24 = vsel %vm1380_vm12, %v1288_v17, -inf }
 0x28e   : > { %v1285_v19 = vsel %vm1221_vm3, %v1145_v15, %v1253_v16  ;;  %v1334_v20 = vpack.c.bf16 %v1302_v18, %v1302_v18  ;;  %v1438_v29 = vsel %vm1380_vm12, %v1302_v18, -inf  ;;  %v992_v16 = vpop.permute.xlu2 %991 }
 0x28f   : > { %v1154_v21 = vpop.f32.mrf.mxu2  ;;  %v1387_v22 = vsel %vm1380_vm12, %v1285_v19, -inf  ;;  %v1317_v23 = vpack.c.bf16 %v1285_v19, %v1285_v19  ;;  %1353 = vst.msk [vmem:[%s2358_s22 + $0x14] sm:$0xf] %vm1347_vm13, %v1320_v62 }
 0x290   : > { %v1155_v26 = vadd.f32 %v1154_v21, %v2328_v30  ;;  %v1189_v28 = vpop.f32.mrf.mxu3  ;;  %1388 = vmax.xlane.f32.xlu1 %v1387_v22  ;;  %1397 = vmax.xlane.f32.xlu0 %v1396_v24  ;;  %1367 = vst.msk [vmem:[%s2358_s22 + $0x4c] sm:$0xf] %vm1347_vm13, %v1334_v20 }
 0x291   : > { %v1190_v31 = vadd.f32 %v1189_v28, %v977_v25  ;;  %1350 = vst.msk [vmem:[%s2358_s22 + $0x8] sm:$0xf] %vm1347_vm13, %v1317_v23  ;;  %1439 = vmax.xlane.f32.xlu2 %v1438_v29  ;;  %v1146_v32 = vpop.f32.mrf.mxu0  ;;  %v997_v29 = vpop.permute.xlu0 %996 }
 0x292   : > { %v1257_v33 = vmul.f32 0.01, %v1155_v26  ;;  %v1147_v42 = vadd.f32 %v1146_v32, %v2324_v27  ;;  %vm1225_vm4 = vcmp.gt.f32.partialorder %v1155_v26, 0.0 }
 0x293   : > { %v1271_v43 = vmul.f32 0.01, %v1190_v31  ;;  %vm1239_vm5 = vcmp.gt.f32.partialorder %v1190_v31, 0.0 }
 0x294   : > { %v1254_v30 = vmul.f32 0.01, %v1147_v42  ;;  %v1289_v45 = vsel %vm1225_vm4, %v1155_v26, %v1257_v33  ;;  %vm1222_vm6 = vcmp.gt.f32.partialorder %v1147_v42, 0.0 }
 0x295   : > { %v1321_v47 = vpack.c.bf16 %v1289_v45, %v1289_v45  ;;  %v1303_v48 = vsel %vm1239_vm5, %v1190_v31, %v1271_v43  ;;  %v1399_v52 = vsel %vm1380_vm12, %v1289_v45, -inf }
 0x296   : > { %v1335_v49 = vpack.c.bf16 %v1303_v48, %v1303_v48  ;;  %v1286_v50 = vsel %vm1222_vm6, %v1147_v42, %v1254_v30  ;;  %v1441_v53 = vsel %vm1380_vm12, %v1303_v48, -inf }
 0x297   : > { %v1156_v51 = vpop.f32.mrf.mxu2  ;;  %1354 = vst.msk [vmem:[%s2358_s22 + $0x18] sm:$0xf] %vm1347_vm13, %v1321_v47  ;;  %v1318_v27 = vpack.c.bf16 %v1286_v50, %v1286_v50  ;;  %v1390_v54 = vsel %vm1380_vm12, %v1286_v50, -inf }
 0x298   : > { %v1157_v56 = vadd.f32 %v1156_v51, %v2336_v34  ;;  %v1191_v57 = vpop.f32.mrf.mxu3  ;;  %1400 = vmax.xlane.f32.xlu1 %v1399_v52  ;;  %1368 = vst.msk [vmem:[%s2358_s22 + $0x50] sm:$0xf] %vm1347_vm13, %v1335_v49  ;;  %1442 = vmax.xlane.f32.xlu0 %v1441_v53  ;;  %v1002_v51 = vpop.permute.xlu1 %1001 }
 0x299   : > { %v1192_v58 = vadd.f32 %v1191_v57, %v982_v55  ;;  %1351 = vst.msk [vmem:[%s2358_s22 + $0xc] sm:$0xf] %vm1347_vm13, %v1318_v27  ;;  %1391 = vmax.xlane.f32.xlu2 %v1390_v54 }
 0x29a   : > { %v1258_v59 = vmul.f32 0.01, %v1157_v56  ;;  %vm1226_vm7 = vcmp.gt.f32.partialorder %v1157_v56, 0.0 }
 0x29b   : > { %v1272_v60 = vmul.f32 0.01, %v1192_v58  ;;  %vm1240_vm8 = vcmp.gt.f32.partialorder %v1192_v58, 0.0 }
 0x29c   : > { %v1290_v61 = vsel %vm1226_vm7, %v1157_v56, %v1258_v59 }
 0x29d   : > { %v1304_v63 = vsel %vm1240_vm8, %v1192_v58, %v1272_v60  ;;  %v1322_v1 = vpack.c.bf16 %v1290_v61, %v1290_v61  ;;  %v1402_v7 = vsel %vm1380_vm12, %v1290_v61, -inf }
 0x29e   : > { %v1336_v2 = vpack.c.bf16 %v1304_v63, %v1304_v63  ;;  %v1444_v3 = vsel %vm1380_vm12, %v1304_v63, -inf  ;;  %v1007_v63 = vpop.permute.xlu2 %1006 }
 0x29f   : > { %v1159_v34 = vpop.f32.mrf.mxu2  ;;  %1355 = vst.msk [vmem:[%s2358_s22 + $0x1c] sm:$0xf] %vm1347_vm13, %v1322_v1 }
 0x2a0   : > { %v1160_v5 = vadd.f32 %v1159_v34, %v2340_v36  ;;  %v1194_v6 = vpop.f32.mrf.mxu3  ;;  %1369 = vst.msk [vmem:[%s2358_s22 + $0x54] sm:$0xf] %vm1347_vm13, %v1336_v2  ;;  %1445 = vmax.xlane.f32.xlu1 %v1444_v3 }
 0x2a1   : > { %v1195_v8 = vadd.f32 %v1194_v6, %v987_v4  ;;  %1403 = vmax.xlane.f32.xlu2 %v1402_v7 }
 0x2a2   : > { %v1259_v9 = vmul.f32 0.01, %v1160_v5  ;;  %vm1227_vm9 = vcmp.gt.f32.partialorder %v1160_v5, 0.0 }
 0x2a3   : > { %v1273_v11 = vmul.f32 0.01, %v1195_v8  ;;  %vm1241_vm10 = vcmp.gt.f32.partialorder %v1195_v8, 0.0 }
 0x2a4   : > { %v1291_v12 = vsel %vm1227_vm9, %v1160_v5, %v1259_v9 }
 0x2a5   : > { %v1323_v13 = vpack.c.bf16 %v1291_v12, %v1291_v12  ;;  %v1405_v14 = vsel %vm1380_vm12, %v1291_v12, -inf  ;;  %v1305_v15 = vsel %vm1241_vm10, %v1195_v8, %v1273_v11  ;;  %v1012_v12 = vpop.permute.xlu0 %1011 }
 0x2a6   : > { %1406 = vmax.xlane.f32.xlu0 %v1405_v14  ;;  %v1337_v36 = vpack.c.bf16 %v1305_v15, %v1305_v15  ;;  %v1447_v18 = vsel %vm1380_vm12, %v1305_v15, -inf }
 0x2a7   : > { %1356 = vst.msk [vmem:[%s2358_s22 + $0x20] sm:$0xf] %vm1347_vm13, %v1323_v13  ;;  %v1161_v10 = vpop.f32.mrf.mxu2 }
 0x2a8   : > { %v1162_v17 = vadd.f32 %v1161_v10, %v2338_v35  ;;  %v1196_v62 = vpop.f32.mrf.mxu3  ;;  %1370 = vst.msk [vmem:[%s2358_s22 + $0x58] sm:$0xf] %vm1347_vm13, %v1337_v36 }
 0x2a9   : > { %v1197_v19 = vadd.f32 %v1196_v62, %v992_v16  ;;  %1448 = vmax.xlane.f32.xlu2 %v1447_v18 }
 0x2aa   : > { %v1260_v20 = vmul.f32 0.01, %v1162_v17  ;;  %vm1228_vm11 = vcmp.gt.f32.partialorder %v1162_v17, 0.0 }
 0x2ab   : > { %v1274_v21 = vmul.f32 0.01, %v1197_v19  ;;  %vm1242_vm14 = vcmp.gt.f32.partialorder %v1197_v19, 0.0 }
 0x2ac   : > { %v1292_v22 = vsel %vm1228_vm11, %v1162_v17, %v1260_v20 }
 0x2ad   : > { %v1324_v23 = vpack.c.bf16 %v1292_v22, %v1292_v22  ;;  %v1408_v24 = vsel %vm1380_vm12, %v1292_v22, -inf  ;;  %v1306_v25 = vsel %vm1242_vm14, %v1197_v19, %v1274_v21  ;;  %v1017_v21 = vpop.permute.xlu1 %1016 }
 0x2ae   : > { %1409 = vmax.xlane.f32.xlu1 %v1408_v24  ;;  %v1338_v35 = vpack.c.bf16 %v1306_v25, %v1306_v25  ;;  %v1450_v26 = vsel %vm1380_vm12, %v1306_v25, -inf }
 0x2af   : > { %1357 = vst.msk [vmem:[%s2358_s22 + $0x24] sm:$0xf] %vm1347_vm13, %v1324_v23  ;;  %1451 = vmax.xlane.f32.xlu0 %v1450_v26  ;;  %v1164_v28 = vpop.f32.mrf.mxu2 }
 0x2b0   : > { %1371 = vst.msk [vmem:[%s2358_s22 + $0x5c] sm:$0xf] %vm1347_vm13, %v1338_v35  ;;  %v1165_v31 = vadd.f32 %v1164_v28, %v2342_v37  ;;  %v1199_v32 = vpop.f32.mrf.mxu3 }
 0x2b1   : > { %v1200_v33 = vadd.f32 %v1199_v32, %v997_v29 }
 0x2b2   : > { %v1261_v42 = vmul.f32 0.01, %v1165_v31  ;;  %vm1229_vm15 = vcmp.gt.f32.partialorder %v1165_v31, 0.0 }
 0x2b3   : > { %v1275_v43 = vmul.f32 0.01, %v1200_v33  ;;  %vm1243_vm0 = vcmp.gt.f32.partialorder %v1200_v33, 0.0 }
 0x2b4   : > { %v1293_v30 = vsel %vm1229_vm15, %v1165_v31, %v1261_v42  ;;  %v1022_v42 = vpop.permute.xlu2 %1021 }
 0x2b5   : > { %v1307_v45 = vsel %vm1243_vm0, %v1200_v33, %v1275_v43  ;;  %v1325_v47 = vpack.c.bf16 %v1293_v30, %v1293_v30  ;;  %v1411_v48 = vsel %vm1380_vm12, %v1293_v30, -inf }
 0x2b6   : > { %v1339_v49 = vpack.c.bf16 %v1307_v45, %v1307_v45  ;;  %v1453_v50 = vsel %vm1380_vm12, %v1307_v45, -inf  ;;  %1412 = vmax.xlane.f32.xlu2 %v1411_v48 }
 0x2b7   : > { %1454 = vmax.xlane.f32.xlu1 %v1453_v50  ;;  %1358 = vst.msk [vmem:[%s2358_s22 + $0x28] sm:$0xf] %vm1347_vm13, %v1325_v47  ;;  %v1166_v37 = vpop.f32.mrf.mxu2 }
 0x2b8   : > { %1372 = vst.msk [vmem:[%s2358_s22 + $0x60] sm:$0xf] %vm1347_vm13, %v1339_v49  ;;  %v1167_v52 = vadd.f32 %v1166_v37, %v2346_v39  ;;  %v1201_v53 = vpop.f32.mrf.mxu3 }
 0x2b9   : > { %v1202_v27 = vadd.f32 %v1201_v53, %v1002_v51 }
 0x2ba   : > { %v1262_v54 = vmul.f32 0.01, %v1167_v52  ;;  %vm1230_vm1 = vcmp.gt.f32.partialorder %v1167_v52, 0.0 }
 0x2bb   : > { %v1276_v55 = vmul.f32 0.01, %v1202_v27  ;;  %vm1244_vm2 = vcmp.gt.f32.partialorder %v1202_v27, 0.0 }
 0x2bc   : > { %v1294_v56 = vsel %vm1230_vm1, %v1167_v52, %v1262_v54  ;;  %vm1481_vm1 = vcmask 7168  }
 0x2bd   : > { %v1326_v57 = vpack.c.bf16 %v1294_v56, %v1294_v56  ;;  %v1414_v58 = vsel %vm1380_vm12, %v1294_v56, -inf  ;;  %v1308_v59 = vsel %vm1244_vm2, %v1202_v27, %v1276_v55  ;;  %v1027_v27 = vpop.permute.xlu0 %1026 }
 0x2be   : > { %1415 = vmax.xlane.f32.xlu0 %v1414_v58  ;;  %v1340_v60 = vpack.c.bf16 %v1308_v59, %v1308_v59  ;;  %v1456_v61 = vsel %vm1380_vm12, %v1308_v59, -inf }
 0x2bf   : > { %1359 = vst.msk [vmem:[%s2358_s22 + $0x2c] sm:$0xf] %vm1347_vm13, %v1326_v57  ;;  %1457 = vmax.xlane.f32.xlu2 %v1456_v61  ;;  %v1169_v39 = vpop.f32.mrf.mxu2 }
 0x2c0   : > { %1373 = vst.msk [vmem:[%s2358_s22 + $0x64] sm:$0xf] %vm1347_vm13, %v1340_v60  ;;  %v1170_v1 = vadd.f32 %v1169_v39, %v2344_v38  ;;  %v1204_v2 = vpop.f32.mrf.mxu3 }
 0x2c1   : > { %v1205_v34 = vadd.f32 %v1204_v2, %v1007_v63 }
 0x2c2   : > { %v1263_v3 = vmul.f32 0.01, %v1170_v1  ;;  %vm1231_vm3 = vcmp.gt.f32.partialorder %v1170_v1, 0.0 }
 0x2c3   : > { %v1277_v4 = vmul.f32 0.01, %v1205_v34  ;;  %vm1245_vm4 = vcmp.gt.f32.partialorder %v1205_v34, 0.0 }
 0x2c4   : > { %v1295_v5 = vsel %vm1231_vm3, %v1170_v1, %v1263_v3  ;;  %v1032_v1 = vpop.permute.xlu1 %1031 }
 0x2c5   : > { %v1327_v6 = vpack.c.bf16 %v1295_v5, %v1295_v5  ;;  %v1417_v7 = vsel %vm1380_vm12, %v1295_v5, -inf  ;;  %v1309_v8 = vsel %vm1245_vm4, %v1205_v34, %v1277_v4 }
 0x2c6   : > { %1418 = vmax.xlane.f32.xlu1 %v1417_v7  ;;  %v1341_v9 = vpack.c.bf16 %v1309_v8, %v1309_v8  ;;  %v1459_v11 = vsel %vm1380_vm12, %v1309_v8, -inf }
 0x2c7   : > { %1360 = vst.msk [vmem:[%s2358_s22 + $0x30] sm:$0xf] %vm1347_vm13, %v1327_v6  ;;  %1460 = vmax.xlane.f32.xlu0 %v1459_v11  ;;  %v1171_v38 = vpop.f32.mrf.mxu2 }
 0x2c8   : > { %1374 = vst.msk [vmem:[%s2358_s22 + $0x68] sm:$0xf] %vm1347_vm13, %v1341_v9  ;;  %v1172_v13 = vadd.f32 %v1171_v38, %v2348_v40  ;;  %v1206_v14 = vpop.f32.mrf.mxu3 }
 0x2c9   : > { %v1207_v15 = vadd.f32 %v1206_v14, %v1012_v12 }
 0x2ca   : > { %v1264_v36 = vmul.f32 0.01, %v1172_v13  ;;  %vm1232_vm5 = vcmp.gt.f32.partialorder %v1172_v13, 0.0 }
 0x2cb   : > { %v1278_v10 = vmul.f32 0.01, %v1207_v15  ;;  %vm1246_vm6 = vcmp.gt.f32.partialorder %v1207_v15, 0.0 }
 0x2cc   : > { %v1296_v16 = vsel %vm1232_vm5, %v1172_v13, %v1264_v36 }
 0x2cd   : > { %v1310_v17 = vsel %vm1246_vm6, %v1207_v15, %v1278_v10  ;;  %v1328_v62 = vpack.c.bf16 %v1296_v16, %v1296_v16  ;;  %v1420_v18 = vsel %vm1380_vm12, %v1296_v16, -inf }
 0x2ce   : > { %v1342_v19 = vpack.c.bf16 %v1310_v17, %v1310_v17  ;;  %v1462_v20 = vsel %vm1380_vm12, %v1310_v17, -inf  ;;  %1421 = vmax.xlane.f32.xlu2 %v1420_v18 }
 0x2cf   : > { %1463 = vmax.xlane.f32.xlu1 %v1462_v20  ;;  %1361 = vst.msk [vmem:[%s2358_s22 + $0x34] sm:$0xf] %vm1347_vm13, %v1328_v62  ;;  %v1174_v40 = vpop.f32.mrf.mxu2 }
 0x2d0   : > { %1375 = vst.msk [vmem:[%s2358_s22 + $0x6c] sm:$0xf] %vm1347_vm13, %v1342_v19  ;;  %v1175_v22 = vadd.f32 %v1174_v40, %v2353_v44  ;;  %v1209_v23 = vpop.f32.mrf.mxu3 }
 0x2d1   : > { %v1210_v24 = vadd.f32 %v1209_v23, %v1017_v21 }
 0x2d2   : > { %v1265_v25 = vmul.f32 0.01, %v1175_v22  ;;  %vm1233_vm7 = vcmp.gt.f32.partialorder %v1175_v22, 0.0 }
 0x2d3   : > { %v1279_v35 = vmul.f32 0.01, %v1210_v24  ;;  %vm1247_vm8 = vcmp.gt.f32.partialorder %v1210_v24, 0.0 }
 0x2d4   : > { %v1297_v26 = vsel %vm1233_vm7, %v1175_v22, %v1265_v25 }
 0x2d5   : > { %v1329_v28 = vpack.c.bf16 %v1297_v26, %v1297_v26  ;;  %v1423_v29 = vsel %vm1380_vm12, %v1297_v26, -inf  ;;  %v1311_v31 = vsel %vm1247_vm8, %v1210_v24, %v1279_v35 }
 0x2d6   : > { %1424 = vmax.xlane.f32.xlu0 %v1423_v29  ;;  %v1343_v32 = vpack.c.bf16 %v1311_v31, %v1311_v31  ;;  %v1465_v33 = vsel %vm1380_vm12, %v1311_v31, -inf }
 0x2d7   : > { %1362 = vst.msk [vmem:[%s2358_s22 + $0x38] sm:$0xf] %vm1347_vm13, %v1329_v28  ;;  %1466 = vmax.xlane.f32.xlu2 %v1465_v33  ;;  %v1176_v44 = vpop.f32.mrf.mxu2 }
 0x2d8   : > { %1376 = vst.msk [vmem:[%s2358_s22 + $0x70] sm:$0xf] %vm1347_vm13, %v1343_v32  ;;  %v1177_v43 = vadd.f32 %v1176_v44, %v2350_v41  ;;  %v1211_v30 = vpop.f32.mrf.mxu3 }
 0x2d9   : > { %v1212_v45 = vadd.f32 %v1211_v30, %v1022_v42 }
 0x2da   : > { %v1266_v47 = vmul.f32 0.01, %v1177_v43  ;;  %vm1234_vm9 = vcmp.gt.f32.partialorder %v1177_v43, 0.0 }
 0x2db   : > { %v1280_v48 = vmul.f32 0.01, %v1212_v45  ;;  %vm1248_vm10 = vcmp.gt.f32.partialorder %v1212_v45, 0.0 }
 0x2dc   : > { %v1298_v49 = vsel %vm1234_vm9, %v1177_v43, %v1266_v47 }
 0x2dd   : > { %v1330_v50 = vpack.c.bf16 %v1298_v49, %v1298_v49  ;;  %v1426_v37 = vsel %vm1380_vm12, %v1298_v49, -inf  ;;  %v1312_v51 = vsel %vm1248_vm10, %v1212_v45, %v1280_v48 }
 0x2de   : > { %1427 = vmax.xlane.f32.xlu1 %v1426_v37  ;;  %v1344_v52 = vpack.c.bf16 %v1312_v51, %v1312_v51  ;;  %v1468_v12 = vsel %vm1380_vm12, %v1312_v51, -inf }
 0x2df   : > { %1363 = vst.msk [vmem:[%s2358_s22 + $0x3c] sm:$0xf] %vm1347_vm13, %v1330_v50  ;;  %v1179_v53 = vpop.f32.mrf.mxu2 }
 0x2e0   : > { %v1180_v41 = vadd.f32 %v1179_v53, %v2360_v46  ;;  %v1214_v54 = vpop.f32.mrf.mxu3  ;;  %1377 = vst.msk [vmem:[%s2358_s22 + $0x74] sm:$0xf] %vm1347_vm13, %v1344_v52 }
 0x2e1   : > { %v1215_v55 = vadd.f32 %v1214_v54, %v1027_v27 }
 0x2e2   : > { %v1267_v56 = vmul.f32 0.01, %v1180_v41  ;;  %vm1235_vm11 = vcmp.gt.f32.partialorder %v1180_v41, 0.0 }
 0x2e3   : > { %v1281_v57 = vmul.f32 0.01, %v1215_v55  ;;  %vm1249_vm14 = vcmp.gt.f32.partialorder %v1215_v55, 0.0 }
 0x2e4   : > { %v1299_v58 = vsel %vm1235_vm11, %v1180_v41, %v1267_v56 }
 0x2e5   : > { %v1313_v59 = vsel %vm1249_vm14, %v1215_v55, %v1281_v57  ;;  %v1331_v60 = vpack.c.bf16 %v1299_v58, %v1299_v58  ;;  %v1429_v61 = vsel %vm1380_vm12, %v1299_v58, -inf }
 0x2e6   : > { %v1345_v39 = vpack.c.bf16 %v1313_v59, %v1313_v59  ;;  %v1471_v63 = vsel %vm1380_vm12, %v1313_v59, -inf  ;;  %1430 = vmax.xlane.f32.xlu2 %v1429_v61 }
 0x2e7   : > { %1472 = vmax.xlane.f32.xlu1 %v1471_v63  ;;  %1364 = vst.msk [vmem:[%s2358_s22 + $0x40] sm:$0xf] %vm1347_vm13, %v1331_v60  ;;  %v1181_v46 = vpop.f32.mrf.mxu2 }
 0x2e8   : > { %1378 = vst.msk [vmem:[%s2358_s22 + $0x78] sm:$0xf] %vm1347_vm13, %v1345_v39  ;;  %v1182_v2 = vadd.f32 %v1181_v46, %v2365_v0  ;;  %v1216_v34 = vpop.f32.mrf.mxu3 }
 0x2e9   : > { %v1217_v3 = vadd.f32 %v1216_v34, %v1032_v1 }
 0x2ea   : > { %v1268_v4 = vmul.f32 0.01, %v1182_v2  ;;  %vm1236_vm15 = vcmp.gt.f32.partialorder %v1182_v2, 0.0 }
 0x2eb   : > { %v1282_v5 = vmul.f32 0.01, %v1217_v3  ;;  %vm1250_vm0 = vcmp.gt.f32.partialorder %v1217_v3, 0.0 }
 0x2ec   : > { %v1300_v6 = vsel %vm1236_vm15, %v1182_v2, %v1268_v4 }
 0x2ed   : > { %v1332_v7 = vpack.c.bf16 %v1300_v6, %v1300_v6  ;;  %v1432_v8 = vsel %vm1380_vm12, %v1300_v6, -inf  ;;  %v1314_v9 = vsel %vm1250_vm0, %v1217_v3, %v1282_v5 }
 0x2ee   : > { %1433 = vmax.xlane.f32.xlu0 %v1432_v8  ;;  %v1346_v11 = vpack.c.bf16 %v1314_v9, %v1314_v9  ;;  %v1474_v38 = vsel %vm1380_vm12, %v1314_v9, -inf }
 0x2ef   : > { %1365 = vst.msk [vmem:[%s2358_s22 + $0x44] sm:$0xf] %vm1347_vm13, %v1332_v7  ;;  %1475 = vmax.xlane.f32.xlu2 %v1474_v38 }
 0x2f0   : > { %1379 = vst.msk [vmem:[%s2358_s22 + $0x7c] sm:$0xf] %vm1347_vm13, %v1346_v11 }
 0x2f3   : > { %v1383_v0 = vpop.xlane.xlu2 %1382 }
 0x2f4   : > { %1482 = vst.msk [vmem:[%s2477_s26] sm:$0xff] %vm1481_vm1, %v1383_v0 }
 0x2f6   : > { %1469 = vmax.xlane.f32.xlu0 %v1468_v12 }
 0x2fa   : > { %v1437_v13 = vpop.xlane.xlu1 %1436 }
 0x2fb   : > { %1500 = vst.msk [vmem:[%s2477_s26 + $0x90] sm:$0xff] %vm1481_vm1, %v1437_v13  ;;  %v1386_v14 = vpop.xlane.xlu0 %1385  ;;  %v1395_v15 = vpop.xlane.xlu2 %1394 }
 0x2fc   : > { %1483 = vst.msk [vmem:[%s2477_s26 + $0x8] sm:$0xff] %vm1481_vm1, %v1386_v14 }
 0x2fd   : > { %1486 = vst.msk [vmem:[%s2477_s26 + $0x20] sm:$0xff] %vm1481_vm1, %v1395_v15 }
 0x303   : > { %v1389_v36 = vpop.xlane.xlu1 %1388  ;;  %v1398_v10 = vpop.xlane.xlu0 %1397 }
 0x304   : > { %1484 = vst.msk [vmem:[%s2477_s26 + $0x10] sm:$0xff] %vm1481_vm1, %v1389_v36  ;;  %v1440_v16 = vpop.xlane.xlu2 %1439 }
 0x305   : > { %1487 = vst.msk [vmem:[%s2477_s26 + $0x28] sm:$0xff] %vm1481_vm1, %v1398_v10 }
 0x306   : > { %1501 = vst.msk [vmem:[%s2477_s26 + $0x98] sm:$0xff] %vm1481_vm1, %v1440_v16 }
 0x30b   : > { %v1401_v17 = vpop.xlane.xlu1 %1400  ;;  %v1443_v62 = vpop.xlane.xlu0 %1442 }
 0x30c   : > { %1488 = vst.msk [vmem:[%s2477_s26 + $0x30] sm:$0xff] %vm1481_vm1, %v1401_v17  ;;  %v1392_v18 = vpop.xlane.xlu2 %1391 }
 0x30d   : > { %1502 = vst.msk [vmem:[%s2477_s26 + $0xa0] sm:$0xff] %vm1481_vm1, %v1443_v62 }
 0x30e   : > { %1485 = vst.msk [vmem:[%s2477_s26 + $0x18] sm:$0xff] %vm1481_vm1, %v1392_v18 }
 0x313   : > { %v1446_v19 = vpop.xlane.xlu1 %1445 }
 0x314   : > { %1503 = vst.msk [vmem:[%s2477_s26 + $0xa8] sm:$0xff] %vm1481_vm1, %v1446_v19  ;;  %v1404_v20 = vpop.xlane.xlu2 %1403 }
 0x315   : > { %1489 = vst.msk [vmem:[%s2477_s26 + $0x38] sm:$0xff] %vm1481_vm1, %v1404_v20 }
 0x319   : > { %v1407_v40 = vpop.xlane.xlu0 %1406 }
 0x31a   : > { %1490 = vst.msk [vmem:[%s2477_s26 + $0x40] sm:$0xff] %vm1481_vm1, %v1407_v40 }
 0x31c   : > { %v1449_v21 = vpop.xlane.xlu2 %1448 }
 0x31d   : > { %1504 = vst.msk [vmem:[%s2477_s26 + $0xb0] sm:$0xff] %vm1481_vm1, %v1449_v21 }
 0x321   : > { %v1410_v22 = vpop.xlane.xlu1 %1409 }
 0x322   : > { %1491 = vst.msk [vmem:[%s2477_s26 + $0x48] sm:$0xff] %vm1481_vm1, %v1410_v22  ;;  %v1452_v23 = vpop.xlane.xlu0 %1451 }
 0x323   : > { %1505 = vst.msk [vmem:[%s2477_s26 + $0xb8] sm:$0xff] %vm1481_vm1, %v1452_v23 }
 0x329   : > { %v1413_v24 = vpop.xlane.xlu2 %1412 }
 0x32a   : > { %v1455_v25 = vpop.xlane.xlu1 %1454  ;;  %1492 = vst.msk [vmem:[%s2477_s26 + $0x50] sm:$0xff] %vm1481_vm1, %v1413_v24 }
 0x32b   : > { %1506 = vst.msk [vmem:[%s2477_s26 + $0xc0] sm:$0xff] %vm1481_vm1, %v1455_v25 }
 0x331   : > { %v1416_v35 = vpop.xlane.xlu0 %1415 }
 0x332   : > { %1493 = vst.msk [vmem:[%s2477_s26 + $0x58] sm:$0xff] %vm1481_vm1, %v1416_v35  ;;  %v1458_v26 = vpop.xlane.xlu2 %1457 }
 0x333   : > { %1507 = vst.msk [vmem:[%s2477_s26 + $0xc8] sm:$0xff] %vm1481_vm1, %v1458_v26 }
 0x339   : > { %v1419_v28 = vpop.xlane.xlu1 %1418 }
 0x33a   : > { %1494 = vst.msk [vmem:[%s2477_s26 + $0x60] sm:$0xff] %vm1481_vm1, %v1419_v28  ;;  %v1461_v29 = vpop.xlane.xlu0 %1460 }
 0x33b   : > { %1508 = vst.msk [vmem:[%s2477_s26 + $0xd0] sm:$0xff] %vm1481_vm1, %v1461_v29 }
 0x341   : > { %v1422_v31 = vpop.xlane.xlu2 %1421 }
 0x342   : > { %v1464_v32 = vpop.xlane.xlu1 %1463  ;;  %1495 = vst.msk [vmem:[%s2477_s26 + $0x68] sm:$0xff] %vm1481_vm1, %v1422_v31 }
 0x343   : > { %1509 = vst.msk [vmem:[%s2477_s26 + $0xd8] sm:$0xff] %vm1481_vm1, %v1464_v32 }
 0x349   : > { %v1425_v33 = vpop.xlane.xlu0 %1424 }
 0x34a   : > { %1496 = vst.msk [vmem:[%s2477_s26 + $0x70] sm:$0xff] %vm1481_vm1, %v1425_v33  ;;  %v1467_v44 = vpop.xlane.xlu2 %1466 }
 0x34b   : > { %1510 = vst.msk [vmem:[%s2477_s26 + $0xe0] sm:$0xff] %vm1481_vm1, %v1467_v44 }
 0x351   : > { %v1428_v42 = vpop.xlane.xlu1 %1427 }
 0x352   : > { %1497 = vst.msk [vmem:[%s2477_s26 + $0x78] sm:$0xff] %vm1481_vm1, %v1428_v42 }
 0x359   : > { %v1431_v43 = vpop.xlane.xlu2 %1430 }
 0x35a   : > { %v1473_v30 = vpop.xlane.xlu1 %1472  ;;  %1498 = vst.msk [vmem:[%s2477_s26 + $0x80] sm:$0xff] %vm1481_vm1, %v1431_v43 }
 0x35b   : > { %1512 = vst.msk [vmem:[%s2477_s26 + $0xf0] sm:$0xff] %vm1481_vm1, %v1473_v30 }
 0x361   : > { %v1434_v45 = vpop.xlane.xlu0 %1433 }
 0x362   : > { %1499 = vst.msk [vmem:[%s2477_s26 + $0x88] sm:$0xff] %vm1481_vm1, %v1434_v45  ;;  %v1476_v47 = vpop.xlane.xlu2 %1475 }
 0x363   : > { %1513 = vst.msk [vmem:[%s2477_s26 + $0xf8] sm:$0xff] %vm1481_vm1, %v1476_v47 }
 0x369   : > { %v1470_v48 = vpop.xlane.xlu0 %1469 }
 0x36a   : > { %1511 = vst.msk [vmem:[%s2477_s26 + $0xe8] sm:$0xff] %vm1481_vm1, %v1470_v48 }
 0x36b PF: > { %s19_s29 = sadd.s32 1, %s1987_s29   ;;  %s2562_s27 = smov %s1983_s28 }
 0x36c   : > { %p16_p5 = scmp.ge.s32.totalorder %s19_s29, 4   ;;  %s2563_s28 = smov %s2565_s30 }
 0x36e   :  { %18 = sbr.rel (!%p16_p5) target bundleno = 2 (0x2), region = 98 }

</bundles_post_ra>
